<compile_context>
chip_gen: v7x
topology: tpu7x:2x2x1
jax: 0.10.0
libtpu: 0.0.40
codegen_flags: <defaults>
</compile_context>

<pallas_src>
import jax
import jax.numpy as jnp
from jax.experimental import pallas as pl
from jax.experimental.pallas import tpu as pltpu


def _round_up(x, m):
    return ((x + m - 1) // m) * m


def _mlp_kernel(x_ref,
                wp_ref, bp_ref,
                wh_ref, bh_ref,
                wf_ref, bf_ref,
                out_ref):
    cdt = wp_ref.dtype  # MXU input dtype (bf16 default / f32); accumulation is f32
    # x = linear_projection(x)
    h = jnp.dot(x_ref[...].astype(cdt), wp_ref[...],
                preferred_element_type=jnp.float32) + bp_ref[...]
    # 4 x (Linear -> ReLU): unrolled Python loop (full LLO scheduler visibility),
    # hidden weights packed as one [4, H, H] operand, biases as [4, 1, H].
    for l in range(4):
        h = jnp.dot(h.astype(cdt), wh_ref[l],
                    preferred_element_type=jnp.float32) + bh_ref[l]
        h = jnp.maximum(h, 0.0)
    # dropout (eval mode) -> identity.
    # fc: output features pre-padded to a multiple of 256 -> lane-dense stores.
    out_ref[...] = (jnp.dot(h.astype(cdt), wf_ref[...],
                            preferred_element_type=jnp.float32)
                    + bf_ref[...]).astype(out_ref.dtype)


def linear_forward(x, params, *, block_b=None, single_buffer_weights=False,
                   vmem_limit_bytes=None):
    """Fused MLP forward as a single Pallas kernel.

    x: [B, in_dim] float32 (cast to the weight dtype inside the kernel).
    params: dict from init_params (pre-transposed, pre-cast weights; padded fc;
            f32 (1, out) / (4, 1, out) biases).
    """
    B, in_dim = x.shape
    c_pad = params["wf"].shape[1]          # padded (lane-dense) output width
    num_classes = params["num_classes"]

    # ---- batch tiling (no divisibility requirement: pad, then slice back) ----
    if block_b is None:
        if B <= 128:
            block_b = _round_up(max(B, 8), 8)          # one small tile
        elif B <= 512:
            # Two roughly-equal 128-aligned tiles: keeps both v7x TensorCores
            # busy, and still only 2 large steps on single-TC v5e/v6e.
            block_b = _round_up(pl.cdiv(B, 2), 128)
        else:
            block_b = 256                              # big M tiles, >=3 steps
    B_pad = _round_up(B, block_b)
    if B_pad != B:
        x = jnp.pad(x, ((0, B_pad - B), (0, 0)))

    wp, bp = params["wp"], params["bp"]
    wh, bh = params["wh"], params["bh"]
    wf, bf = params["wf"], params["bf"]
    operands = (x, wp, bp, wh, bh, wf, bf)

    # ---- explicit VMEM budget: resident weights + pipelined x/out blocks ----
    if vmem_limit_bytes is None:
        wbuf = 1 if single_buffer_weights else 2
        resident = wbuf * sum(int(a.size) * a.dtype.itemsize
                              for a in (wp, bp, wh, bh, wf, bf))
        resident += 2 * block_b * in_dim * x.dtype.itemsize   # x double buffer
        resident += 2 * block_b * c_pad * 4                   # f32 out double buffer
        vmem_limit_bytes = min(max(int(resident * 1.25) + (4 << 20), 32 << 20),
                               64 << 20)                      # <= v7x physical

    # ---- BlockSpecs ----
    def invariant_spec(arr):
        zeros = (0,) * arr.ndim
        if single_buffer_weights:
            # Grid-invariant block: single buffer halves weight VMEM residency.
            return pl.BlockSpec(arr.shape, lambda i, z=zeros: z,
                                pipeline_mode=pl.Buffered(1))
        return pl.BlockSpec(arr.shape, lambda i, z=zeros: z)

    in_specs = [pl.BlockSpec((block_b, in_dim), lambda i: (i, 0))]   # x over batch
    in_specs += [invariant_spec(a) for a in (wp, bp, wh, bh, wf, bf)]
    out_spec = pl.BlockSpec((block_b, c_pad), lambda i: (i, 0))

    grid_spec = pltpu.PrefetchScalarGridSpec(
        num_scalar_prefetch=0,
        grid=(B_pad // block_b,),
        in_specs=in_specs,
        out_specs=out_spec,
    )

    out = pl.pallas_call(
        _mlp_kernel,
        out_shape=jax.ShapeDtypeStruct((B_pad, c_pad), jnp.float32),
        grid_spec=grid_spec,
        compiler_params=pltpu.CompilerParams(
            dimension_semantics=("parallel",),
            vmem_limit_bytes=vmem_limit_bytes),
    )(*operands)

    return out[:B, :num_classes]


def init_params(key, in_dim, hidden_dim, num_classes, *,
                weight_dtype=jnp.bfloat16):
    """PyTorch-style (uniform +-1/sqrt(fan_in)) init.

    Weights stored transposed [in_features, out_features] and pre-cast to
    `weight_dtype` (bf16 default -> native MXU path, half the DMA/VMEM bytes).
    The 4 hidden layers are packed into wh:[4,H,H] / bh:[4,1,H].
    Biases stay float32 (added on the f32 accumulator).
    fc weight/bias are zero-padded to a multiple of 256 output features.
    """
    def linear_init(k, fan_in, fan_out):
        kw, kb = jax.random.split(k)
        bound = 1.0 / jnp.sqrt(jnp.float32(fan_in))
        w = jax.random.uniform(kw, (fan_in, fan_out), jnp.float32, -bound, bound)
        b = jax.random.uniform(kb, (1, fan_out), jnp.float32, -bound, bound)
        return w, b

    keys = jax.random.split(key, 6)
    params = {}
    wp, bp = linear_init(keys[0], in_dim, hidden_dim)
    params["wp"], params["bp"] = wp.astype(weight_dtype), bp

    whs, bhs = [], []
    for i in range(4):
        w, b = linear_init(keys[1 + i], hidden_dim, hidden_dim)
        whs.append(w)
        bhs.append(b)
    params["wh"] = jnp.stack(whs).astype(weight_dtype)          # [4, H, H]
    params["bh"] = jnp.stack(bhs)                               # [4, 1, H] f32

    wf, bf = linear_init(keys[5], hidden_dim, num_classes)
    c_pad = max(256, _round_up(num_classes, 256))               # 256-wide MXU pass
    params["wf"] = (jnp.zeros((hidden_dim, c_pad), jnp.float32)
                    .at[:, :num_classes].set(wf)).astype(weight_dtype)
    params["bf"] = jnp.zeros((1, c_pad), jnp.float32).at[:, :num_classes].set(bf)
    params["num_classes"] = num_classes
    return params


def reference_forward(x, params):
    """Pure-JAX reference (f32), using the same (possibly bf16) stored weights."""
    h = x @ params["wp"].astype(jnp.float32) + params["bp"]
    for l in range(4):
        h = jnp.maximum(h @ params["wh"][l].astype(jnp.float32) + params["bh"][l], 0.0)
    out = h @ params["wf"].astype(jnp.float32) + params["bf"]
    return out[:, :params["num_classes"]]


if __name__ == "__main__":
    # Small (but MXU-friendly) shapes consistent with the module's structure.
    B, IN_DIM, HIDDEN, NUM_CLASSES = 256, 512, 256, 16

    key = jax.random.PRNGKey(0)
    kx, kp = jax.random.split(key)
    x = jax.random.normal(kx, (B, IN_DIM), jnp.float32)

    # Default (recommended) path: bf16 weights -> bf16-in / f32-accumulate MXU.
    params_bf16 = init_params(kp, IN_DIM, HIDDEN, NUM_CLASSES,
                              weight_dtype=jnp.bfloat16)
    ref_bf16 = reference_forward(x, params_bf16)
    out_bf16 = jax.block_until_ready(linear_forward(x, params_bf16))
    assert out_bf16.shape == (B, NUM_CLASSES)
    assert jnp.allclose(out_bf16, ref_bf16, atol=5e-2, rtol=5e-2)

    # f32-weight path (closest to the module semantics short of f64).
    params_f32 = init_params(kp, IN_DIM, HIDDEN, NUM_CLASSES,
                             weight_dtype=jnp.float32)
    ref_f32 = reference_forward(x, params_f32)
    out_f32 = jax.block_until_ready(linear_forward(x, params_f32))
    assert out_f32.shape == (B, NUM_CLASSES)
    assert jnp.allclose(out_f32, ref_f32, atol=2e-3, rtol=2e-3)

    # Ragged batch (exercises zero-pad + slice-back path).
    xr = x[:100]
    out_r = jax.block_until_ready(linear_forward(xr, params_bf16))
    assert out_r.shape == (100, NUM_CLASSES)
    assert jnp.allclose(out_r, ref_bf16[:100], atol=5e-2, rtol=5e-2)

    print("KERNEL_OK")
</pallas_src>

<mosaic_0001>
module attributes {stable_mosaic.version = 11 : i64} {
  func.func @_mlp_kernel(%arg0: i32, %arg1: memref<128x512xf32, #tpu.memory_space<vmem>>, %arg2: memref<512x256xbf16, #tpu.memory_space<vmem>>, %arg3: memref<1x256xf32, #tpu.memory_space<vmem>>, %arg4: memref<4x256x256xbf16, #tpu.memory_space<vmem>>, %arg5: memref<4x1x256xf32, #tpu.memory_space<vmem>>, %arg6: memref<256x256xbf16, #tpu.memory_space<vmem>>, %arg7: memref<1x256xf32, #tpu.memory_space<vmem>>, %arg8: memref<128x256xf32, #tpu.memory_space<vmem>>) attributes {dimension_semantics = [#tpu.dimension_semantics<parallel>], iteration_bounds = array<i64: 2>, scalar_prefetch = 0 : i64, scratch_operands = 0 : i64, tpu.core_type = #tpu.core_type<tc>, window_params = [{transform_indices = @transform_0, window_bounds = array<i64: 128, 512>}, {pipeline_mode = #tpu.pipeline_mode<synchronous>, transform_indices = @transform_1, window_bounds = array<i64: 512, 256>}, {pipeline_mode = #tpu.pipeline_mode<synchronous>, transform_indices = @transform_2, window_bounds = array<i64: 1, 256>}, {pipeline_mode = #tpu.pipeline_mode<synchronous>, transform_indices = @transform_3, window_bounds = array<i64: 4, 256, 256>}, {pipeline_mode = #tpu.pipeline_mode<synchronous>, transform_indices = @transform_4, window_bounds = array<i64: 4, 1, 256>}, {pipeline_mode = #tpu.pipeline_mode<synchronous>, transform_indices = @transform_5, window_bounds = array<i64: 256, 256>}, {pipeline_mode = #tpu.pipeline_mode<synchronous>, transform_indices = @transform_6, window_bounds = array<i64: 1, 256>}, {transform_indices = @transform_7, window_bounds = array<i64: 128, 256>}]} {
    %c0 = arith.constant 0 : index
    %c0_0 = arith.constant 0 : index
    %0 = vector.load %arg1[%c0, %c0_0] : memref<128x512xf32, #tpu.memory_space<vmem>>, vector<128x512xf32>
    %1 = arith.truncf %0 : vector<128x512xf32> to vector<128x512xbf16>
    %c0_1 = arith.constant 0 : index
    %c0_2 = arith.constant 0 : index
    %2 = vector.load %arg2[%c0_1, %c0_2] : memref<512x256xbf16, #tpu.memory_space<vmem>>, vector<512x256xbf16>
    %cst = arith.constant dense<0.000000e+00> : vector<128x256xf32>
    %3 = tpu.matmul %1, %2, %cst {dimension_numbers = #tpu.dot_dimension_numbers<[1], [0], [0], [1], [0, 0, 1, 1], [], []>} : vector<128x512xbf16>, vector<512x256xbf16>, vector<128x256xf32> -> vector<128x256xf32>
    %c0_3 = arith.constant 0 : index
    %c0_4 = arith.constant 0 : index
    %4 = vector.load %arg3[%c0_3, %c0_4] : memref<1x256xf32, #tpu.memory_space<vmem>>, vector<1x256xf32>
    %5 = vector.broadcast %4 : vector<1x256xf32> to vector<128x256xf32>
    %6 = arith.addf %3, %5 : vector<128x256xf32>
    %7 = arith.truncf %6 : vector<128x256xf32> to vector<128x256xbf16>
    %c0_5 = arith.constant 0 : index
    %c0_6 = arith.constant 0 : index
    %c0_7 = arith.constant 0 : index
    %8 = vector.load %arg4[%c0_5, %c0_6, %c0_7] : memref<4x256x256xbf16, #tpu.memory_space<vmem>>, vector<1x256x256xbf16>
    %9 = vector.shape_cast %8 : vector<1x256x256xbf16> to vector<256x256xbf16>
    %cst_8 = arith.constant dense<0.000000e+00> : vector<128x256xf32>
    %10 = tpu.matmul %7, %9, %cst_8 {dimension_numbers = #tpu.dot_dimension_numbers<[1], [0], [0], [1], [0, 0, 1, 1], [], []>} : vector<128x256xbf16>, vector<256x256xbf16>, vector<128x256xf32> -> vector<128x256xf32>
    %c0_9 = arith.constant 0 : index
    %c0_10 = arith.constant 0 : index
    %c0_11 = arith.constant 0 : index
    %11 = vector.load %arg5[%c0_9, %c0_10, %c0_11] : memref<4x1x256xf32, #tpu.memory_space<vmem>>, vector<1x1x256xf32>
    %12 = vector.shape_cast %11 : vector<1x1x256xf32> to vector<1x256xf32>
    %13 = vector.broadcast %12 : vector<1x256xf32> to vector<128x256xf32>
    %14 = arith.addf %10, %13 : vector<128x256xf32>
    %cst_12 = arith.constant 0.000000e+00 : f32
    %15 = vector.broadcast %cst_12 : f32 to vector<128x256xf32>
    %16 = arith.maximumf %14, %15 : vector<128x256xf32>
    %17 = arith.truncf %16 : vector<128x256xf32> to vector<128x256xbf16>
    %c1 = arith.constant 1 : index
    %c0_13 = arith.constant 0 : index
    %c0_14 = arith.constant 0 : index
    %18 = vector.load %arg4[%c1, %c0_13, %c0_14] : memref<4x256x256xbf16, #tpu.memory_space<vmem>>, vector<1x256x256xbf16>
    %19 = vector.shape_cast %18 : vector<1x256x256xbf16> to vector<256x256xbf16>
    %cst_15 = arith.constant dense<0.000000e+00> : vector<128x256xf32>
    %20 = tpu.matmul %17, %19, %cst_15 {dimension_numbers = #tpu.dot_dimension_numbers<[1], [0], [0], [1], [0, 0, 1, 1], [], []>} : vector<128x256xbf16>, vector<256x256xbf16>, vector<128x256xf32> -> vector<128x256xf32>
    %c1_16 = arith.constant 1 : index
    %c0_17 = arith.constant 0 : index
    %c0_18 = arith.constant 0 : index
    %21 = vector.load %arg5[%c1_16, %c0_17, %c0_18] : memref<4x1x256xf32, #tpu.memory_space<vmem>>, vector<1x1x256xf32>
    %22 = vector.shape_cast %21 : vector<1x1x256xf32> to vector<1x256xf32>
    %23 = vector.broadcast %22 : vector<1x256xf32> to vector<128x256xf32>
    %24 = arith.addf %20, %23 : vector<128x256xf32>
    %cst_19 = arith.constant 0.000000e+00 : f32
    %25 = vector.broadcast %cst_19 : f32 to vector<128x256xf32>
    %26 = arith.maximumf %24, %25 : vector<128x256xf32>
    %27 = arith.truncf %26 : vector<128x256xf32> to vector<128x256xbf16>
    %c2 = arith.constant 2 : index
    %c0_20 = arith.constant 0 : index
    %c0_21 = arith.constant 0 : index
    %28 = vector.load %arg4[%c2, %c0_20, %c0_21] : memref<4x256x256xbf16, #tpu.memory_space<vmem>>, vector<1x256x256xbf16>
    %29 = vector.shape_cast %28 : vector<1x256x256xbf16> to vector<256x256xbf16>
    %cst_22 = arith.constant dense<0.000000e+00> : vector<128x256xf32>
    %30 = tpu.matmul %27, %29, %cst_22 {dimension_numbers = #tpu.dot_dimension_numbers<[1], [0], [0], [1], [0, 0, 1, 1], [], []>} : vector<128x256xbf16>, vector<256x256xbf16>, vector<128x256xf32> -> vector<128x256xf32>
    %c2_23 = arith.constant 2 : index
    %c0_24 = arith.constant 0 : index
    %c0_25 = arith.constant 0 : index
    %31 = vector.load %arg5[%c2_23, %c0_24, %c0_25] : memref<4x1x256xf32, #tpu.memory_space<vmem>>, vector<1x1x256xf32>
    %32 = vector.shape_cast %31 : vector<1x1x256xf32> to vector<1x256xf32>
    %33 = vector.broadcast %32 : vector<1x256xf32> to vector<128x256xf32>
    %34 = arith.addf %30, %33 : vector<128x256xf32>
    %cst_26 = arith.constant 0.000000e+00 : f32
    %35 = vector.broadcast %cst_26 : f32 to vector<128x256xf32>
    %36 = arith.maximumf %34, %35 : vector<128x256xf32>
    %37 = arith.truncf %36 : vector<128x256xf32> to vector<128x256xbf16>
    %c3 = arith.constant 3 : index
    %c0_27 = arith.constant 0 : index
    %c0_28 = arith.constant 0 : index
    %38 = vector.load %arg4[%c3, %c0_27, %c0_28] : memref<4x256x256xbf16, #tpu.memory_space<vmem>>, vector<1x256x256xbf16>
    %39 = vector.shape_cast %38 : vector<1x256x256xbf16> to vector<256x256xbf16>
    %cst_29 = arith.constant dense<0.000000e+00> : vector<128x256xf32>
    %40 = tpu.matmul %37, %39, %cst_29 {dimension_numbers = #tpu.dot_dimension_numbers<[1], [0], [0], [1], [0, 0, 1, 1], [], []>} : vector<128x256xbf16>, vector<256x256xbf16>, vector<128x256xf32> -> vector<128x256xf32>
    %c3_30 = arith.constant 3 : index
    %c0_31 = arith.constant 0 : index
    %c0_32 = arith.constant 0 : index
    %41 = vector.load %arg5[%c3_30, %c0_31, %c0_32] : memref<4x1x256xf32, #tpu.memory_space<vmem>>, vector<1x1x256xf32>
    %42 = vector.shape_cast %41 : vector<1x1x256xf32> to vector<1x256xf32>
    %43 = vector.broadcast %42 : vector<1x256xf32> to vector<128x256xf32>
    %44 = arith.addf %40, %43 : vector<128x256xf32>
    %cst_33 = arith.constant 0.000000e+00 : f32
    %45 = vector.broadcast %cst_33 : f32 to vector<128x256xf32>
    %46 = arith.maximumf %44, %45 : vector<128x256xf32>
    %47 = arith.truncf %46 : vector<128x256xf32> to vector<128x256xbf16>
    %c0_34 = arith.constant 0 : index
    %c0_35 = arith.constant 0 : index
    %48 = vector.load %arg6[%c0_34, %c0_35] : memref<256x256xbf16, #tpu.memory_space<vmem>>, vector<256x256xbf16>
    %cst_36 = arith.constant dense<0.000000e+00> : vector<128x256xf32>
    %49 = tpu.matmul %47, %48, %cst_36 {dimension_numbers = #tpu.dot_dimension_numbers<[1], [0], [0], [1], [0, 0, 1, 1], [], []>} : vector<128x256xbf16>, vector<256x256xbf16>, vector<128x256xf32> -> vector<128x256xf32>
    %c0_37 = arith.constant 0 : index
    %c0_38 = arith.constant 0 : index
    %50 = vector.load %arg7[%c0_37, %c0_38] : memref<1x256xf32, #tpu.memory_space<vmem>>, vector<1x256xf32>
    %51 = vector.broadcast %50 : vector<1x256xf32> to vector<128x256xf32>
    %52 = arith.addf %49, %51 : vector<128x256xf32>
    %c0_39 = arith.constant 0 : index
    %c0_40 = arith.constant 0 : index
    %53 = vector.load %arg8[%c0_39, %c0_40] : memref<128x256xf32, #tpu.memory_space<vmem>>, vector<128x256xf32>
    tpu.vector_store %arg8[%c0_39, %c0_40], %52 {strides = array<i32>} : memref<128x256xf32, #tpu.memory_space<vmem>>, vector<128x256xf32>,
    return
  }
  func.func @transform_0(%arg0: i32) -> (i32, i32) {
    %c0_i32 = arith.constant 0 : i32
    %c0_i32_0 = arith.constant 0 : i32
    return %arg0, %c0_i32 : i32, i32
  }
  func.func @transform_1(%arg0: i32) -> (i32, i32) {
    %c0_i32 = arith.constant 0 : i32
    %c0_i32_0 = arith.constant 0 : i32
    %c0_i32_1 = arith.constant 0 : i32
    return %c0_i32, %c0_i32_0 : i32, i32
  }
  func.func @transform_2(%arg0: i32) -> (i32, i32) {
    %c0_i32 = arith.constant 0 : i32
    %c0_i32_0 = arith.constant 0 : i32
    %c0_i32_1 = arith.constant 0 : i32
    return %c0_i32, %c0_i32_0 : i32, i32
  }
  func.func @transform_3(%arg0: i32) -> (i32, i32, i32) {
    %c0_i32 = arith.constant 0 : i32
    %c0_i32_0 = arith.constant 0 : i32
    %c0_i32_1 = arith.constant 0 : i32
    %c0_i32_2 = arith.constant 0 : i32
    return %c0_i32, %c0_i32_0, %c0_i32_1 : i32, i32, i32
  }
  func.func @transform_4(%arg0: i32) -> (i32, i32, i32) {
    %c0_i32 = arith.constant 0 : i32
    %c0_i32_0 = arith.constant 0 : i32
    %c0_i32_1 = arith.constant 0 : i32
    %c0_i32_2 = arith.constant 0 : i32
    return %c0_i32, %c0_i32_0, %c0_i32_1 : i32, i32, i32
  }
  func.func @transform_5(%arg0: i32) -> (i32, i32) {
    %c0_i32 = arith.constant 0 : i32
    %c0_i32_0 = arith.constant 0 : i32
    %c0_i32_1 = arith.constant 0 : i32
    return %c0_i32, %c0_i32_0 : i32, i32
  }
  func.func @transform_6(%arg0: i32) -> (i32, i32) {
    %c0_i32 = arith.constant 0 : i32
    %c0_i32_0 = arith.constant 0 : i32
    %c0_i32_1 = arith.constant 0 : i32
    return %c0_i32, %c0_i32_0 : i32, i32
  }
  func.func @transform_7(%arg0: i32) -> (i32, i32) {
    %c0_i32 = arith.constant 0 : i32
    %c0_i32_0 = arith.constant 0 : i32
    return %arg0, %c0_i32 : i32, i32
  }
}

</mosaic_0001>

<bundles_post_ra>
// kernel: tpu_custom_call.1
= control target key start
LH: loop header
LB: loop body
LE: loop exit
PB: predicated region body
PF: predicated region fallthrough
CT: control target
= control target key end

     0   :  { %12 = vsyncpa [#allocation3], 0  ;;  %s4747_s0 = inlined_call_operand.hbm [shape: f32[256,512], index: 0, kind: input, shape index: {}]   ;;  %s4748_s1 = inlined_call_operand.hbm [shape: bf16[512,256], index: 1, kind: input, shape index: {}]   ;;  %s4749_s2 = inlined_call_operand.vmem [shape: f32[1,256], index: 2, kind: input, shape index: {}]   ;;  %s4750_s3 = inlined_call_operand.hbm [shape: bf16[4,256,256], index: 3, kind: input, shape index: {}]   ;;  %s4751_s4 = inlined_call_operand.vmem [shape: f32[4,1,256], index: 4, kind: input, shape index: {}]   ;;  %s4752_s5 = inlined_call_operand.hbm [shape: bf16[256,256], index: 5, kind: input, shape index: {}]   ;;  %s4753_s6 = inlined_call_operand.vmem [shape: f32[1,256], index: 6, kind: input, shape index: {}]   ;;  %s4754_s7 = inlined_call_operand.hbm [shape: f32[256,256], index: 7, kind: output, shape index: {}]  }
   0x1   :  { %14 = vsyncpa [#allocation3 + $0x1], 0 }
   0x2   :  { %15 = vsyncpa [#allocation6], 0 }
   0x3   :  { %16 = vsyncpa [#allocation9], 0 }
   0x4   :  { %17 = vsyncpa [#allocation4], 0 }
   0x5   :  { %19 = vsyncpa [#allocation4 + $0x1], 0  ;;  %s4019_s24 = smov 0   ;;  %s4021_s25 = smov 0  }
   0x6   :  { %s4023_s26 = smov 0   ;;  %s4025_s27 = smov 0  }
   0x7 LB: > { %s4040_s28 = sadd.s32 4294967295, %s3966_s27   ;;  %s3010_s29 = sadd.s32 4294967294, %s3966_s27   ;;  %s3966_s27 = sphi %s4025_s27, %s4780_s27   ;;  %s3962_s26 = sphi %s4023_s26, %s4779_s26   ;;  %s3958_s25 = sphi %s4021_s25, %s4778_s25   ;;  %s3954_s24 = sphi %s4019_s24, %s4777_s24  }
   0x8   : > { %p45_p0 = scmp.ne.s32.totalorder %s3958_s25, %s3954_s24  ;;  %p4755_p1 = scmp.eq.s32.totalorder %s4040_s28, 0 }
   0x9   : > { %p201_p3 = scmp.eq.s32.totalorder %s3010_s29, 1  ;;  %p3011_p5 = scmp.ge.s32.totalorder %s3966_s27, 1 }
   0xa   : > { %p4049_p4 = por %p4755_p1, %p45_p0  ;;  %p208_p7 = scmp.lt.s32.totalorder %s3966_s27, 3 }
   0xb   : > { %p4054_p6 = por %p201_p3, %p45_p0  ;;  %s3968_s10 = smov [#allocation5]  }
   0xc   : > { %s4759_s30 = scalar_select %p4049_p4, 1, 0 }
   0xd   : > { %s4760_s8 = scalar_select %p4054_p6, 1, 0 }
   0xe   : > { %p4059_p8 = pnand %p3011_p5, %p208_p7  ;;  %s220_s11 = sshll.u32 %s3968_s10, 4  ;;  %s4063_s11 = int_to_ptr.vmem [resolvable:$true] %s220_s11 }
   0xf   : > { %4761 = sst [smem:[#allocation15_spill]] %s4760_s8  ;;  %s3969_s13 = smov [#allocation7]  }
  0x10   : > { %s4762_s9 = scalar_select %p4059_p8, 1, 0 }
  0x11   : > { %p3375_p9 = pneg %p4059_p8  ;;  %s236_s14 = sshll.u32 %s3969_s13, 4  ;;  %s4074_s14 = int_to_ptr.vmem [resolvable:$true] %s236_s14 }
  0x12   : > { %s3970_s15 = smov [#allocation8]   ;;  %s3778_s19 = scalar_lea.hbm %s4748_s1, 8192 }
  0x13   : > { %p4070_p11 = pnand %p3375_p9, %p4755_p1  ;;  %s4076_s16 = sshll.u32 %s3970_s15, 4  ;;  %s253_s16 = int_to_ptr.vmem [resolvable:$true] %s4076_s16 }
  0x14   : > { %p3779_p12 = scmp.ne.s32.totalorder %s4748_s1, %s3778_s19  ;;  %p3785_p5 = scmp.lt.u32.totalorder %s3778_s19, %s4748_s1 }
  0x15   : > { %p4086_p13 = pneg %p4070_p11 }
  0x17   : > { %p3781_p0 = pnand %p4086_p13, %p3779_p12 }
  0x19   : > { %p3782_p3 = pneg %p3781_p0 }
  0x1b   : > { %p3787_p7 = pnand %p3785_p5, %p3782_p3 }
  0x1d   : > { %3790 = shalt.err (!%p3787_p7)
}
  0x1e   : > { %s3791_s10 = scalar_lea.vmem %s4063_s11, 8192  ;;  %p3799_p2 = scmp.lt.s32.totalorder %s4063_s11, %s4063_s11 }
  0x1f   : > { %p3792_p9 = scmp.ne.s32.totalorder %s4063_s11, %s3791_s10  ;;  %p3800_p6 = scmp.lt.s32.totalorder %s3791_s10, %s3791_s10 }
  0x21   : > { %p3794_p10 = pnand %p3792_p9, %p4086_p13  ;;  %p3801_p12 = por %p3800_p6, %p3799_p2 }
  0x23   : > { %p3795_p1 = pneg %p3794_p10 }
  0x25   : > { %p3802_p0 = pnand %p3801_p12, %p3795_p1 }
  0x27   : > { %3805 = shalt.err (!%p3802_p0)
}
  0x28   : > { %s3971_s13 = smov 128   ;;  %s3972_s15 = smov 8  }
  0x29   : > { %3378 = dma.hbm_to_vmem [thread:$0]  (!%p4070_p11), %s4748_s1, 8192, %s4063_s11, [#allocation6], %s3971_s13, %s3971_s13, %s3972_s15  }
  0x2a   : > { %s3806_s21 = scalar_lea.hbm %s4750_s3, 16384 }
  0x2b   : > { %p3807_p1 = scmp.ne.s32.totalorder %s4750_s3, %s3806_s21  ;;  %p3813_p10 = scmp.lt.u32.totalorder %s3806_s21, %s4750_s3 }
  0x2d   : > { %p3809_p2 = pnand %p3807_p1, %p4086_p13 }
  0x2f   : > { %p3810_p6 = pneg %p3809_p2 }
  0x31   : > { %p3815_p3 = pnand %p3813_p10, %p3810_p6 }
  0x33   : > { %3818 = shalt.err (!%p3815_p3)
}
  0x34   : > { %s3819_s11 = scalar_lea.vmem %s4074_s14, 16384  ;;  %p3827_p12 = scmp.lt.s32.totalorder %s4074_s14, %s4074_s14 }
  0x35   : > { %p3820_p5 = scmp.ne.s32.totalorder %s4074_s14, %s3819_s11  ;;  %p3828_p0 = scmp.lt.s32.totalorder %s3819_s11, %s3819_s11 }
  0x37   : > { %p3822_p7 = pnand %p3820_p5, %p4086_p13  ;;  %p3829_p1 = por %p3828_p0, %p3827_p12 }
  0x39   : > { %p3823_p9 = pneg %p3822_p7 }
  0x3b   : > { %p3830_p2 = pnand %p3829_p1, %p3823_p9 }
  0x3d   : > { %3833 = shalt.err (!%p3830_p2)
}
  0x3e   : > { %3381 = dma.hbm_to_vmem [thread:$0]  (!%p4070_p11), %s4750_s3, 16384, %s4074_s14, [#allocation6], %s3971_s13, %s3971_s13, %s3972_s15  }
  0x3f   : > { %s3834_s20 = scalar_lea.hbm %s4752_s5, 4096 }
  0x40   : > { %p3835_p6 = scmp.ne.s32.totalorder %s4752_s5, %s3834_s20  ;;  %p3841_p5 = scmp.lt.u32.totalorder %s3834_s20, %s4752_s5 }
  0x42   : > { %p3837_p10 = pnand %p3835_p6, %p4086_p13 }
  0x44   : > { %p3838_p3 = pneg %p3837_p10 }
  0x46   : > { %p3843_p7 = pnand %p3841_p5, %p3838_p3 }
  0x48   : > { %3846 = shalt.err (!%p3843_p7)
}
  0x49   : > { %s3847_s11 = scalar_lea.vmem %s253_s16, 4096  ;;  %p3855_p1 = scmp.lt.s32.totalorder %s253_s16, %s253_s16 }
  0x4a   : > { %p3848_p9 = scmp.ne.s32.totalorder %s253_s16, %s3847_s11  ;;  %p3856_p2 = scmp.lt.s32.totalorder %s3847_s11, %s3847_s11 }
  0x4c   : > { %p3850_p12 = pnand %p3848_p9, %p4086_p13  ;;  %p3857_p4 = por %p3856_p2, %p3855_p1 }
  0x4e   : > { %p3851_p0 = pneg %p3850_p12 }
  0x50   : > { %p3858_p8 = pnand %p3857_p4, %p3851_p0 }
  0x52   : > { %3861 = shalt.err (!%p3858_p8)
}
  0x53   : > { %3384 = dma.hbm_to_vmem [thread:$0]  (!%p4070_p11), %s4752_s5, 4096, %s253_s16, [#allocation9], %s3971_s13, %s3971_s13, %s3972_s15  }
  0x54   : > { %s4159_s22 = sadd.s32 1, %s3966_s27   ;;  %s32_s17 = sadd.s32 1, %s3962_s26 }
  0x55   : > { %s29_s12 = ssub.s32 %s3966_s27, %s4159_s22  ;;  %p39_p8 = scmp.ne.s32.totalorder %s3962_s26, %s3958_s25 }
  0x56   : > { %p30_p4 = scmp.eq.s32.totalorder %s29_s12, 0  ;;  %p40_p13 = scmp.eq.s32.totalorder %s3966_s27, 0 }
  0x57   : > { %p3396_p6 = scmp.lt.s32.totalorder %s3966_s27, 2  ;;  %p4765_p3 = scmp.eq.s32.totalorder %s4040_s28, 1 }
  0x58   : > { %s4169_s18 = scalar_select %p30_p4, %s3962_s26, %s32_s17  }
  0x59   : > { %p41_p10 = por %p40_p13, %p39_p8  ;;  %p4173_p5 = por %p4765_p3, %p39_p8 }
  0x5a   : > { %s269_s20 = sand.u32 1, %s3962_s26   ;;  %s3260_s21 = sshll.u32 %s3966_s27, 13 }
  0x5b   : > { %s3016_s16 = sshll.u32 %s269_s20, 9  ;;  %s4182_s23 = scalar_lea.hbm %s4747_s0, %s3260_s21 }
  0x5c   : > { %s273_s29 = scalar_lea.vmem [#allocation2], %s3016_s16  ;;  %p4184_p11 = pnand %p3396_p6, %p41_p10 }
  0x5d   : > { %s281_s10 = sshll.u32 %s273_s29, 4  ;;  %s4190_s14 = scalar_lea.sflag [#allocation3], %s269_s20  ;;  %s4188_s10 = int_to_ptr.vmem [resolvable:$true] %s281_s10 }
  0x5e   : > { %s3862_s8 = scalar_lea.hbm %s4182_s23, 8192  ;;  %p3864_p9 = pneg %p4184_p11 }
  0x5f   : > { %p3863_p7 = scmp.ne.s32.totalorder %s4182_s23, %s3862_s8  ;;  %s3867_s21 = scalar_lea.hbm %s4747_s0, 16384 }
  0x60   : > { %p3868_p1 = scmp.lt.u32.totalorder %s4182_s23, %s4747_s0  ;;  %p3869_p2 = scmp.lt.u32.totalorder %s3867_s21, %s3862_s8 }
  0x61   : > { %p3865_p12 = pnand %p3864_p9, %p3863_p7  ;;  %p3871_p8 = scmp.lt.u32.totalorder %s3862_s8, %s4182_s23 }
  0x62   : > { %p3870_p4 = por %p3869_p2, %p3868_p1 }
  0x63   : > { %p3866_p0 = pneg %p3865_p12 }
  0x64   : > { %p3872_p13 = por %p3871_p8, %p3870_p4 }
  0x66   : > { %p3873_p6 = pnand %p3872_p13, %p3866_p0 }
  0x68   : > { %3876 = shalt.err (!%p3873_p6)
}
  0x69   : > { %s3877_s20 = scalar_lea.vmem %s4188_s10, 8192  ;;  %s3973_s15 = smov [#allocation2]  }
  0x6a   : > { %p3878_p10 = scmp.ne.s32.totalorder %s4188_s10, %s3877_s20  ;;  %s3882_s29 = sshll.u32 %s3973_s15, 4  ;;  %s3883_s29 = int_to_ptr.vmem [resolvable:$false] %s3882_s29 }
  0x6b   : > { %s3884_s12 = scalar_lea.vmem %s3883_s29, 16384  ;;  %p3885_p12 = scmp.lt.s32.totalorder %s4188_s10, %s3883_s29 }
  0x6c   : > { %p3880_p3 = pnand %p3878_p10, %p3864_p9  ;;  %p3886_p1 = scmp.lt.s32.totalorder %s3884_s12, %s3877_s20 }
  0x6e   : > { %p3881_p7 = pneg %p3880_p3  ;;  %p3887_p2 = por %p3886_p1, %p3885_p12 }
  0x70   : > { %p3888_p4 = pnand %p3887_p2, %p3881_p7 }
  0x72   : > { %3891 = shalt.err (!%p3888_p4)
}
  0x73   : > { %s3974_s8 = smov 512   ;;  %s3975_s17 = smov 32  }
  0x74   : > { %3388 = dma.hbm_to_vmem [thread:$0]  (!%p4184_p11), %s4182_s23, 8192, %s4188_s10, %s4190_s14, %s3974_s8, %s3974_s8, %s3975_s17  }
  0x75   : > { %p4768_p9 = scmp.ne.s32.totalorder %s4762_s9, 0 }
  0x76   : > { %s4221_s21 = sand.u32 (!%p4768_p9), 1, %s3958_s25   ;;  %p4769_p0 = scmp.ne.s32.totalorder (!%p4768_p9), %s4759_s30, 0 }
  0x77   : > { %293 = sbr.rel (%p4768_p9) target bundleno = 1659 (0x67b), region = 48  ;;  %s3021_s16 = sshll.u32 (!%p4768_p9), %s4221_s21, 9 }
  0x78   : > { %s296_s13 = scalar_lea.sflag (!%p4768_p9), [#allocation3], %s4221_s21  ;;  %s4225_s20 = scalar_lea.vmem (!%p4768_p9), [#allocation2], %s3021_s16 }
  0x7e   : > { %3937 = dma.done.wait (%p4769_p0), %s296_s13, 8192  }
  0x7f   : > { %3939 = vsyncadd (%p4769_p0), %s296_s13, 4294959104  ;;  %p4770_p11 = scmp.eq.s32.totalorder %s4040_s28, 0 }
  0x81   : > { %3941 = dma.done.wait (%p4770_p11), [#allocation6], 24576   ;;  %p4771_p8 = pmov %p4770_p11 }
  0x83   : > { %3943 = vsyncadd (%p4771_p8), [#allocation6], 4294942720  ;;  %p4772_p13 = pmov %p4771_p8 }
  0x84   : > { %p4773_p6 = pmov %p4771_p8 }
  0x85   : > { %3945 = dma.done.wait (%p4772_p13), [#allocation9], 4096  }
  0x86   : > { %3947 = vsyncadd (%p4773_p6), [#allocation9], 4294963200  ;;  %v3442_v0 = vld [vmem:[#allocation5 + $0x4] ss:$8 sps:$4 sm:$0xff]   ;;  %v3444_v1 = vld [vmem:[#allocation5] ss:$8 sps:$4 sm:$0xff]  }
  0x87   : > { %836 = vmatprep.subr.bf16.mxu0 %v3442_v0  ;;  %v3445_v2 = vld [vmem:[#allocation5 + $0x14] ss:$8 sps:$4 sm:$0xff]   ;;  %v3447_v3 = vld [vmem:[#allocation5 + $0x10] ss:$8 sps:$4 sm:$0xff]   ;;  %v3448_v4 = vld [vmem:[#allocation5 + $0x24] ss:$8 sps:$4 sm:$0xff]  }
  0x88   : > { %837 = vmatpush1.bf16.msra.mxu0 %v3444_v1  ;;  %v3450_v5 = vld [vmem:[#allocation5 + $0x20] ss:$8 sps:$4 sm:$0xff]   ;;  %v3451_v6 = vld [vmem:[#allocation5 + $0x34] ss:$8 sps:$4 sm:$0xff]   ;;  %v3453_v7 = vld [vmem:[#allocation5 + $0x30] ss:$8 sps:$4 sm:$0xff]  }
  0x89   : > { %838 = vmatprep.subr.bf16.mxu0 %v3445_v2  ;;  %v3454_v8 = vld [vmem:[#allocation5 + $0x44] ss:$8 sps:$4 sm:$0xff]   ;;  %v3456_v9 = vld [vmem:[#allocation5 + $0x40] ss:$8 sps:$4 sm:$0xff]   ;;  %v3457_v10 = vld [vmem:[#allocation5 + $0x54] ss:$8 sps:$4 sm:$0xff]  }
  0x8a   : > { %v3459_v11 = vld [vmem:[#allocation5 + $0x50] ss:$8 sps:$4 sm:$0xff]   ;;  %v3460_v12 = vld [vmem:[#allocation5 + $0x64] ss:$8 sps:$4 sm:$0xff]   ;;  %v3462_v16 = vld [vmem:[#allocation5 + $0x60] ss:$8 sps:$4 sm:$0xff]  }
  0x8b   : > { %v345_v13 = vld [vmem:[%s4225_s20 + $0x8] sm:$0xff]  ;;  %v3463_v17 = vld [vmem:[#allocation5 + $0x74] ss:$8 sps:$4 sm:$0xff]   ;;  %v3465_v18 = vld [vmem:[#allocation5 + $0x70] ss:$8 sps:$4 sm:$0xff]   ;;  %s3025_s13 = sshll.u32 %s4221_s21, 8 }
  0x8c   : > { %839 = vmatpush1.bf16.msra.mxu0 %v3447_v3  ;;  %v349_v14 = vld [vmem:[%s4225_s20 + $0x28] sm:$0xff]  ;;  %v3469_v21 = vld [vmem:[#allocation5 + $0x94] ss:$8 sps:$4 sm:$0xff]   ;;  %v3471_v22 = vld [vmem:[#allocation5 + $0x90] ss:$8 sps:$4 sm:$0xff]   ;;  %s3262_s30 = sshll.u32 %s4040_s28, 12 }
  0x8d   : > { %840 = vmatprep.subr.bf16.mxu0 %v3448_v4  ;;  %v409_v15 = vpack.c.bf16 %v349_v14, %v345_v13  ;;  %v3466_v19 = vld [vmem:[#allocation5 + $0x84] ss:$8 sps:$4 sm:$0xff]   ;;  %v3468_v20 = vld [vmem:[#allocation5 + $0x80] ss:$8 sps:$4 sm:$0xff]   ;;  %v3475_v25 = vld [vmem:[#allocation5 + $0xb4] ss:$8 sps:$4 sm:$0xff]   ;;  %s4697_s11 = scalar_lea.hbm %s4754_s7, %s3262_s30 }
  0x8e   : > { %v3472_v23 = vld [vmem:[#allocation5 + $0xa4] ss:$8 sps:$4 sm:$0xff]   ;;  %v3474_v24 = vld [vmem:[#allocation5 + $0xa0] ss:$8 sps:$4 sm:$0xff]   ;;  %v3477_v26 = vld [vmem:[#allocation5 + $0xb0] ss:$8 sps:$4 sm:$0xff]  }
  0x8f   : > { %868 = vmatprep.mubr.bf16.mxu0 %v409_v15  ;;  %v3478_v27 = vld [vmem:[#allocation5 + $0xc4] ss:$8 sps:$4 sm:$0xff]   ;;  %v3480_v28 = vld [vmem:[#allocation5 + $0xc0] ss:$8 sps:$4 sm:$0xff]   ;;  %v3481_v29 = vld [vmem:[#allocation5 + $0xd4] ss:$8 sps:$4 sm:$0xff]  }
  0x90   : > { %841 = vmatpush1.bf16.msra.mxu0 %v3450_v5  ;;  %v3483_v30 = vld [vmem:[#allocation5 + $0xd0] ss:$8 sps:$4 sm:$0xff]   ;;  %v3484_v31 = vld [vmem:[#allocation5 + $0xe4] ss:$8 sps:$4 sm:$0xff]   ;;  %v3486_v32 = vld [vmem:[#allocation5 + $0xe0] ss:$8 sps:$4 sm:$0xff]  }
  0x91   : > { %842 = vmatprep.subr.bf16.mxu0 %v3451_v6  ;;  %v3487_v33 = vld [vmem:[#allocation5 + $0xf4] ss:$8 sps:$4 sm:$0xff]   ;;  %v3489_v34 = vld [vmem:[#allocation5 + $0xf0] ss:$8 sps:$4 sm:$0xff]   ;;  %v344_v35 = vld [vmem:[%s4225_s20] sm:$0xff]  ;;  %s2894_s28 = scalar_lea.sflag [#allocation4], %s4221_s21 }
  0x92   : > { %v348_v36 = vld [vmem:[%s4225_s20 + $0x20] sm:$0xff]  ;;  %v353_v38 = vld [vmem:[%s4225_s20 + $0x48] sm:$0xff]  ;;  %v3495_v42 = vld [vmem:[#allocation5 + $0x114] ss:$8 sps:$4 sm:$0xff]   ;;  %s3976_s15 = smov [#allocation10]  }
  0x93   : > { %v3492_v37 = vld [vmem:[#allocation5 + $0x104] ss:$8 sps:$4 sm:$0xff]   ;;  %v408_v40 = vpack.c.bf16 %v348_v36, %v344_v35  ;;  %v3490_v41 = vld [vmem:[#allocation5 + $0x100] ss:$8 sps:$4 sm:$0xff]   ;;  %v3493_v45 = vld [vmem:[#allocation5 + $0x110] ss:$8 sps:$4 sm:$0xff]  }
  0x94   : > { %843 = vmatpush1.bf16.msra.mxu0 %v3453_v7  ;;  %v357_v39 = vld [vmem:[%s4225_s20 + $0x68] sm:$0xff]  ;;  %v352_v46 = vld [vmem:[%s4225_s20 + $0x40] sm:$0xff]  ;;  %v3541_v50 = vld [vmem:[#allocation7 + $0x14] ss:$8 sps:$4 sm:$0xff]   ;;  %s3896_s29 = sshll.u32 %s3976_s15, 4  ;;  %s3897_s29 = int_to_ptr.vmem [resolvable:$false] %s3896_s29 }
  0x95   : > { %844 = vmatprep.subr.bf16.mxu0 %v3454_v8  ;;  %v413_v43 = vpack.c.bf16 %v357_v39, %v353_v38  ;;  %v3538_v44 = vld [vmem:[#allocation7 + $0x4] ss:$8 sps:$4 sm:$0xff]   ;;  %v3540_v48 = vld [vmem:[#allocation7] ss:$8 sps:$4 sm:$0xff]   ;;  %v3543_v53 = vld [vmem:[#allocation7 + $0x10] ss:$8 sps:$4 sm:$0xff]  }
  0x96   : > { %v356_v47 = vld [vmem:[%s4225_s20 + $0x60] sm:$0xff]  ;;  %1282 = vmatprep.subr.bf16.mxu1 %v3538_v44  ;;  %v361_v51 = vld [vmem:[%s4225_s20 + $0x88] sm:$0xff]  ;;  %v3501_v57 = vld [vmem:[#allocation5 + $0x134] ss:$8 sps:$4 sm:$0xff]   ;;  %s3898_s12 = scalar_lea.vmem %s3897_s29, 8192 }
  0x97   : > { %v3498_v49 = vld [vmem:[#allocation5 + $0x124] ss:$8 sps:$4 sm:$0xff]   ;;  %1283 = vmatpush1.bf16.msra.mxu1 %v3540_v48  ;;  %v412_v55 = vpack.c.bf16 %v356_v47, %v352_v46  ;;  %v3496_v56 = vld [vmem:[#allocation5 + $0x120] ss:$8 sps:$4 sm:$0xff]   ;;  %v3499_v60 = vld [vmem:[#allocation5 + $0x130] ss:$8 sps:$4 sm:$0xff]  }
  0x98   : > { %845 = vmatpush1.bf16.msra.mxu0 %v3456_v9  ;;  %v365_v52 = vld [vmem:[%s4225_s20 + $0xa8] sm:$0xff]  ;;  %1284 = vmatprep.subr.bf16.mxu1 %v3541_v50  ;;  %v360_v61 = vld [vmem:[%s4225_s20 + $0x80] sm:$0xff]  ;;  %v3547_v62 = vld [vmem:[#allocation7 + $0x34] ss:$8 sps:$4 sm:$0xff]  }
  0x99   : > { %846 = vmatprep.subr.bf16.mxu0 %v3457_v10  ;;  %v3544_v54 = vld [vmem:[#allocation7 + $0x24] ss:$8 sps:$4 sm:$0xff]   ;;  %v417_v58 = vpack.c.bf16 %v365_v52, %v361_v51  ;;  %v3546_v59 = vld [vmem:[#allocation7 + $0x20] ss:$8 sps:$4 sm:$0xff]   ;;  %v3549_v3 = vld [vmem:[#allocation7 + $0x30] ss:$8 sps:$4 sm:$0xff]  }
  0x9a   : > { %v364_v63 = vld [vmem:[%s4225_s20 + $0xa0] sm:$0xff]  ;;  %v369_v1 = vld [vmem:[%s4225_s20 + $0xc8] sm:$0xff]  ;;  %v3507_v7 = vld [vmem:[#allocation5 + $0x154] ss:$8 sps:$4 sm:$0xff]  }
  0x9b   : > { %1285 = vmatpush1.bf16.msra.mxu1 %v3543_v53  ;;  %v3504_v0 = vld [vmem:[#allocation5 + $0x144] ss:$8 sps:$4 sm:$0xff]   ;;  %v416_v5 = vpack.c.bf16 %v364_v63, %v360_v61  ;;  %v3502_v6 = vld [vmem:[#allocation5 + $0x140] ss:$8 sps:$4 sm:$0xff]   ;;  %v3505_v10 = vld [vmem:[#allocation5 + $0x150] ss:$8 sps:$4 sm:$0xff]  }
  0x9c   : > { %847 = vmatpush1.bf16.msra.mxu0 %v3459_v11  ;;  %1286 = vmatprep.subr.bf16.mxu1 %v3544_v54  ;;  %v373_v2 = vld [vmem:[%s4225_s20 + $0xe8] sm:$0xff]  ;;  %v368_v11 = vld [vmem:[%s4225_s20 + $0xc0] sm:$0xff]  ;;  %v3553_v13 = vld [vmem:[#allocation7 + $0x54] ss:$8 sps:$4 sm:$0xff]  }
  0x9d   : > { %848 = vmatprep.subr.bf16.mxu0 %v3460_v12  ;;  %v3550_v4 = vld [vmem:[#allocation7 + $0x44] ss:$8 sps:$4 sm:$0xff]   ;;  %v421_v8 = vpack.c.bf16 %v373_v2, %v369_v1  ;;  %v3552_v9 = vld [vmem:[#allocation7 + $0x40] ss:$8 sps:$4 sm:$0xff]   ;;  %v3519_v35 = vld [vmem:[#allocation5 + $0x194] ss:$8 sps:$4 sm:$0xff]  }
  0x9e   : > { %v372_v12 = vld [vmem:[%s4225_s20 + $0xe0] sm:$0xff]  ;;  %v377_v15 = vld [vmem:[%s4225_s20 + $0x108] sm:$0xff]  ;;  %v3565_v38 = vld [vmem:[#allocation7 + $0x94] ss:$8 sps:$4 sm:$0xff]  }
  0x9f   : > { %1287 = vmatpush1.bf16.msra.mxu1 %v3546_v59  ;;  %v3510_v14 = vld [vmem:[#allocation5 + $0x164] ss:$8 sps:$4 sm:$0xff]   ;;  %v3564_v36 = vld [vmem:[#allocation7 + $0x80] ss:$8 sps:$4 sm:$0xff]   ;;  %v3517_v39 = vld [vmem:[#allocation5 + $0x190] ss:$8 sps:$4 sm:$0xff]  }
  0xa0   : > { %849 = vmatpush1.bf16.msra.mxu0 %v3462_v16  ;;  %1288 = vmatprep.subr.bf16.mxu1 %v3547_v62  ;;  %v381_v16 = vld [vmem:[%s4225_s20 + $0x128] sm:$0xff]  ;;  %v3571_v52 = vld [vmem:[#allocation7 + $0xb4] ss:$8 sps:$4 sm:$0xff]   ;;  %v3523_v53 = vld [vmem:[#allocation5 + $0x1b0] ss:$8 sps:$4 sm:$0xff]  }
  0xa1   : > { %850 = vmatprep.subr.bf16.mxu0 %v3463_v17  ;;  %v3555_v17 = vld [vmem:[#allocation7 + $0x50] ss:$8 sps:$4 sm:$0xff]   ;;  %v397_v44 = vld [vmem:[%s4225_s20 + $0x1a8] sm:$0xff]  ;;  %v392_v54 = vld [vmem:[%s4225_s20 + $0x180] sm:$0xff] }
  0xa2   : > { %v3568_v46 = vld [vmem:[#allocation7 + $0xa4] ss:$8 sps:$4 sm:$0xff]   ;;  %v3520_v47 = vld [vmem:[#allocation5 + $0x1a0] ss:$8 sps:$4 sm:$0xff]   ;;  %v3573_v59 = vld [vmem:[#allocation7 + $0xb0] ss:$8 sps:$4 sm:$0xff]  }
  0xa3   : > { %1289 = vmatpush1.bf16.msra.mxu1 %v3549_v3  ;;  %v3570_v50 = vld [vmem:[#allocation7 + $0xa0] ss:$8 sps:$4 sm:$0xff]   ;;  %v3531_v63 = vld [vmem:[#allocation5 + $0x1d4] ss:$8 sps:$4 sm:$0xff]   ;;  %v3529_v3 = vld [vmem:[#allocation5 + $0x1d0] ss:$8 sps:$4 sm:$0xff]  }
  0xa4   : > { %851 = vmatpush1.bf16.msra.mxu0 %v3465_v18  ;;  %1290 = vmatprep.subr.bf16.mxu1 %v3550_v4  ;;  %v3556_v18 = vld [vmem:[#allocation7 + $0x64] ss:$8 sps:$4 sm:$0xff]   ;;  %v3526_v61 = vld [vmem:[#allocation5 + $0x1c0] ss:$8 sps:$4 sm:$0xff]   ;;  %v3577_v2 = vld [vmem:[#allocation7 + $0xd4] ss:$8 sps:$4 sm:$0xff]  }
  0xa5   : > { %852 = vmatprep.subr.bf16.mxu0 %v3466_v19  ;;  %v3508_v19 = vld [vmem:[#allocation5 + $0x160] ss:$8 sps:$4 sm:$0xff]  }
  0xa6   : > { %v400_v4 = vld [vmem:[%s4225_s20 + $0x1c0] sm:$0xff] }
  0xa7   : > { %1291 = vmatpush1.bf16.msra.mxu1 %v3552_v9  ;;  %v3579_v9 = vld [vmem:[#allocation7 + $0xd0] ss:$8 sps:$4 sm:$0xff]  }
  0xa8   : > { %853 = vmatpush1.bf16.msra.mxu0 %v3468_v20  ;;  %1292 = vmatprep.subr.bf16.mxu1 %v3553_v13  ;;  %v420_v20 = vpack.c.bf16 %v372_v12, %v368_v11  ;;  %v3537_v12 = vld [vmem:[#allocation5 + $0x1f4] ss:$8 sps:$4 sm:$0xff]  }
  0xa9   : > { %854 = vmatprep.subr.bf16.mxu0 %v3469_v21  ;;  %v3513_v21 = vld [vmem:[#allocation5 + $0x174] ss:$8 sps:$4 sm:$0xff]  }
  0xab   : > { %1293 = vmatpush1.bf16.msra.mxu1 %v3555_v17  ;;  %v355_v17 = vld [vmem:[%s4225_s20 + $0x58] sm:$0xff] }
  0xac   : > { %855 = vmatpush1.bf16.msra.mxu0 %v3471_v22  ;;  %v3558_v22 = vld [vmem:[#allocation7 + $0x60] ss:$8 sps:$4 sm:$0xff]   ;;  %1294 = vmatprep.subr.bf16.mxu1 %v3556_v18  ;;  %v359_v18 = vld [vmem:[%s4225_s20 + $0x78] sm:$0xff] }
  0xad   : > { %856 = vmatprep.subr.bf16.mxu0 %v3472_v23  ;;  %v425_v23 = vpack.c.bf16 %v381_v16, %v377_v15  ;;  %v346_v15 = vld [vmem:[%s4225_s20 + $0x10] sm:$0xff] }
  0xae   : > { %v350_v16 = vld [vmem:[%s4225_s20 + $0x30] sm:$0xff] }
  0xaf   : > { %1295 = vmatpush1.bf16.msra.mxu1 %v3558_v22  ;;  %v358_v22 = vld [vmem:[%s4225_s20 + $0x70] sm:$0xff] }
  0xb0   : > { %857 = vmatpush1.bf16.msra.mxu0 %v3474_v24  ;;  %v3559_v24 = vld [vmem:[#allocation7 + $0x74] ss:$8 sps:$4 sm:$0xff]  }
  0xb1   : > { %858 = vmatprep.subr.bf16.mxu0 %v3475_v25  ;;  %v3511_v25 = vld [vmem:[#allocation5 + $0x170] ss:$8 sps:$4 sm:$0xff]   ;;  %1296 = vmatprep.subr.bf16.mxu1 %v3559_v24 }
  0xb2   : > { %v367_v24 = vld [vmem:[%s4225_s20 + $0xb8] sm:$0xff] }
  0xb4   : > { %859 = vmatpush1.bf16.msra.mxu0 %v3477_v26  ;;  %v376_v26 = vld [vmem:[%s4225_s20 + $0x100] sm:$0xff] }
  0xb5   : > { %860 = vmatprep.subr.bf16.mxu0 %v3478_v27  ;;  %v380_v27 = vld [vmem:[%s4225_s20 + $0x120] sm:$0xff] }
  0xb8   : > { %861 = vmatpush1.bf16.msra.mxu0 %v3480_v28  ;;  %v3516_v28 = vld [vmem:[#allocation5 + $0x184] ss:$8 sps:$4 sm:$0xff]  }
  0xb9   : > { %862 = vmatprep.subr.bf16.mxu0 %v3481_v29  ;;  %v385_v29 = vld [vmem:[%s4225_s20 + $0x148] sm:$0xff] }
  0xbc   : > { %863 = vmatpush1.bf16.msra.mxu0 %v3483_v30  ;;  %v389_v30 = vld [vmem:[%s4225_s20 + $0x168] sm:$0xff] }
  0xbd   : > { %864 = vmatprep.subr.bf16.mxu0 %v3484_v31  ;;  %v3561_v31 = vld [vmem:[#allocation7 + $0x70] ss:$8 sps:$4 sm:$0xff]  }
  0xbe   : > { %1297 = vmatpush1.bf16.msra.mxu1 %v3561_v31 }
  0xc0   : > { %865 = vmatpush1.bf16.msra.mxu0 %v3486_v32  ;;  %v3562_v32 = vld [vmem:[#allocation7 + $0x84] ss:$8 sps:$4 sm:$0xff]  }
  0xc1   : > { %866 = vmatprep.subr.bf16.mxu0 %v3487_v33  ;;  %v3514_v33 = vld [vmem:[#allocation5 + $0x180] ss:$8 sps:$4 sm:$0xff]   ;;  %1298 = vmatprep.subr.bf16.mxu1 %v3562_v32 }
  0xc2   : > { %1299 = vmatpush1.bf16.msra.mxu1 %v3564_v36  ;;  %v383_v36 = vld [vmem:[%s4225_s20 + $0x138] sm:$0xff] }
  0xc3   : > { %1300 = vmatprep.subr.bf16.mxu1 %v3565_v38 }
  0xc4   : > { %867 = vmatpush1.bf16.msra.mxu0 %v3489_v34  ;;  %v424_v34 = vpack.c.bf16 %v380_v27, %v376_v26  ;;  %v362_v27 = vld [vmem:[%s4225_s20 + $0x90] sm:$0xff] }
  0xc5   : > { %949 = vmatprep.subr.bf16.mxu0 %v3492_v37  ;;  %v429_v37 = vpack.c.bf16 %v389_v30, %v385_v29  ;;  %v371_v29 = vld [vmem:[%s4225_s20 + $0xd8] sm:$0xff] }
  0xc6   : > { %v375_v30 = vld [vmem:[%s4225_s20 + $0xf8] sm:$0xff] }
  0xc7   : > { %869 = vmatmul.mubr.bf16.vlgmr.msra.gmra.mrb[0].mxu0 %v408_v40  ;;  %v384_v40 = vld [vmem:[%s4225_s20 + $0x140] sm:$0xff]  ;;  %v423_v32 = vpack.c.bf16 %v375_v30, %v371_v29 }
  0xc8   : > { %950 = vmatpush1.bf16.msra.mxu0 %v3490_v41  ;;  %878 = vmatprep.mubr.bf16.mxu0 %v413_v43  ;;  %v388_v41 = vld [vmem:[%s4225_s20 + $0x160] sm:$0xff]  ;;  %v393_v43 = vld [vmem:[%s4225_s20 + $0x188] sm:$0xff] }
  0xc9   : > { %951 = vmatprep.subr.bf16.mxu0 %v3495_v42  ;;  %v3522_v42 = vld [vmem:[#allocation5 + $0x1a4] ss:$8 sps:$4 sm:$0xff]   ;;  %v428_v48 = vpack.c.bf16 %v388_v41, %v384_v40  ;;  %v433_v51 = vpack.c.bf16 %v397_v44, %v393_v43  ;;  %v382_v40 = vld [vmem:[%s4225_s20 + $0x130] sm:$0xff]  ;;  %v387_v41 = vld [vmem:[%s4225_s20 + $0x158] sm:$0xff] }
  0xcc   : > { %952 = vmatpush1.bf16.msra.mxu0 %v3493_v45  ;;  %v3567_v45 = vld [vmem:[#allocation7 + $0x90] ss:$8 sps:$4 sm:$0xff]  }
  0xcd   : > { %953 = vmatprep.subr.bf16.mxu0 %v3498_v49  ;;  %v3525_v49 = vld [vmem:[#allocation5 + $0x1b4] ss:$8 sps:$4 sm:$0xff]   ;;  %1301 = vmatpush1.bf16.msra.mxu1 %v3567_v45 }
  0xce   : > { %1302 = vmatprep.subr.bf16.mxu1 %v3568_v46  ;;  %v386_v45 = vld [vmem:[%s4225_s20 + $0x150] sm:$0xff] }
  0xcf   : > { %879 = vmatmul.mubr.bf16.gmra.mrb[4].mxu0 %v412_v55  ;;  %v396_v55 = vld [vmem:[%s4225_s20 + $0x1a0] sm:$0xff]  ;;  %v390_v46 = vld [vmem:[%s4225_s20 + $0x170] sm:$0xff] }
  0xd0   : > { %954 = vmatpush1.bf16.msra.mxu0 %v3496_v56  ;;  %888 = vmatprep.mubr.bf16.mxu0 %v417_v58  ;;  %v3528_v56 = vld [vmem:[#allocation5 + $0x1c4] ss:$8 sps:$4 sm:$0xff]   ;;  %v432_v62 = vpack.c.bf16 %v396_v55, %v392_v54  ;;  %v407_v54 = vld [vmem:[%s4225_s20 + $0x1f8] sm:$0xff] }
  0xd1   : > { %955 = vmatprep.subr.bf16.mxu0 %v3501_v57  ;;  %v401_v57 = vld [vmem:[%s4225_s20 + $0x1c8] sm:$0xff]  ;;  %1303 = vmatpush1.bf16.msra.mxu1 %v3570_v50 }
  0xd2   : > { %v405_v58 = vld [vmem:[%s4225_s20 + $0x1e8] sm:$0xff]  ;;  %1304 = vmatprep.subr.bf16.mxu1 %v3571_v52  ;;  %v398_v52 = vld [vmem:[%s4225_s20 + $0x1b0] sm:$0xff] }
  0xd3   : > { %v437_v1 = vpack.c.bf16 %v405_v58, %v401_v57  ;;  %v402_v57 = vld [vmem:[%s4225_s20 + $0x1d0] sm:$0xff] }
  0xd4   : > { %956 = vmatpush1.bf16.msra.mxu0 %v3499_v60  ;;  %v3574_v60 = vld [vmem:[#allocation7 + $0xc4] ss:$8 sps:$4 sm:$0xff]   ;;  %v406_v58 = vld [vmem:[%s4225_s20 + $0x1f0] sm:$0xff] }
  0xd5   : > { %957 = vmatprep.subr.bf16.mxu0 %v3504_v0  ;;  %v3576_v0 = vld [vmem:[#allocation7 + $0xc0] ss:$8 sps:$4 sm:$0xff]   ;;  %1305 = vmatpush1.bf16.msra.mxu1 %v3573_v59  ;;  %v438_v59 = vpack.c.bf16 %v406_v58, %v402_v57 }
  0xd6   : > { %1306 = vmatprep.subr.bf16.mxu1 %v3574_v60  ;;  %v3580_v60 = vld [vmem:[#allocation7 + $0xe4] ss:$8 sps:$4 sm:$0xff]  }
  0xd7   : > { %889 = vmatmul.mubr.bf16.gmra.mrb[8].mxu0 %v416_v5  ;;  %v404_v5 = vld [vmem:[%s4225_s20 + $0x1e0] sm:$0xff] }
  0xd8   : > { %958 = vmatpush1.bf16.msra.mxu0 %v3502_v6  ;;  %898 = vmatprep.mubr.bf16.mxu0 %v421_v8  ;;  %v3534_v6 = vld [vmem:[#allocation5 + $0x1e4] ss:$8 sps:$4 sm:$0xff]   ;;  %v351_v8 = vld [vmem:[%s4225_s20 + $0x38] sm:$0xff]  ;;  %v436_v11 = vpack.c.bf16 %v404_v5, %v400_v4  ;;  %v504_v4 = vld [vmem:[%s4749_s2] sm:$0x3] }
  0xd9   : > { %959 = vmatprep.subr.bf16.mxu0 %v3507_v7  ;;  %v347_v7 = vld [vmem:[%s4225_s20 + $0x18] sm:$0xff]  ;;  %1307 = vmatpush1.bf16.msra.mxu1 %v3576_v0  ;;  %v3588_v0 = vld [vmem:[#allocation7 + $0x104] ss:$8 sps:$4 sm:$0xff]  }
  0xda   : > { %1308 = vmatprep.subr.bf16.mxu1 %v3577_v2  ;;  %v411_v13 = vpack.c.bf16 %v351_v8, %v347_v7 }
  0xdc   : > { %960 = vmatpush1.bf16.msra.mxu0 %v3505_v10  ;;  %v3532_v10 = vld [vmem:[#allocation5 + $0x1e0] ss:$8 sps:$4 sm:$0xff]  }
  0xdd   : > { %961 = vmatprep.subr.bf16.mxu0 %v3510_v14  ;;  %1309 = vmatpush1.bf16.msra.mxu1 %v3579_v9  ;;  %v3535_v14 = vld [vmem:[#allocation5 + $0x1f0] ss:$8 sps:$4 sm:$0xff]  }
  0xde   : > { %1310 = vmatprep.subr.bf16.mxu1 %v3580_v60  ;;  %v3604_v60 = vld [vmem:[#allocation7 + $0x160] ss:$8 sps:$4 sm:$0xff]  }
  0xdf   : > { %899 = vmatmul.mubr.bf16.gmra.mrb[12].mxu0 %v420_v20  ;;  %v415_v20 = vpack.c.bf16 %v359_v18, %v355_v17  ;;  %v3586_v18 = vld [vmem:[#allocation7 + $0x100] ss:$8 sps:$4 sm:$0xff]  }
  0xe0   : > { %962 = vmatpush1.bf16.msra.mxu0 %v3508_v19  ;;  %908 = vmatprep.mubr.bf16.mxu0 %v425_v23  ;;  %v410_v19 = vpack.c.bf16 %v350_v16, %v346_v15  ;;  %v363_v23 = vld [vmem:[%s4225_s20 + $0x98] sm:$0xff] }
  0xe1   : > { %963 = vmatprep.subr.bf16.mxu0 %v3513_v21  ;;  %v354_v21 = vld [vmem:[%s4225_s20 + $0x50] sm:$0xff]  ;;  %v419_v26 = vpack.c.bf16 %v367_v24, %v363_v23 }
  0xe2   : > { %v3589_v23 = vld [vmem:[#allocation7 + $0x110] ss:$8 sps:$4 sm:$0xff]  }
  0xe4   : > { %964 = vmatpush1.bf16.msra.mxu0 %v3511_v25  ;;  %v414_v25 = vpack.c.bf16 %v358_v22, %v354_v21 }
  0xe5   : > { %965 = vmatprep.subr.bf16.mxu0 %v3516_v28  ;;  %v366_v28 = vld [vmem:[%s4225_s20 + $0xb0] sm:$0xff] }
  0xe6   : > { %v418_v31 = vpack.c.bf16 %v366_v28, %v362_v27  ;;  %v3594_v27 = vld [vmem:[#allocation7 + $0x124] ss:$8 sps:$4 sm:$0xff]  }
  0xe7   : > { %909 = vmatmul.mubr.bf16.gmra.mrb[16].mxu0 %v424_v34  ;;  %v374_v34 = vld [vmem:[%s4225_s20 + $0xf0] sm:$0xff] }
  0xe8   : > { %966 = vmatpush1.bf16.msra.mxu0 %v3514_v33  ;;  %918 = vmatprep.mubr.bf16.mxu0 %v429_v37  ;;  %v370_v33 = vld [vmem:[%s4225_s20 + $0xd0] sm:$0xff] }
  0xe9   : > { %967 = vmatprep.subr.bf16.mxu0 %v3519_v35  ;;  %v379_v35 = vld [vmem:[%s4225_s20 + $0x118] sm:$0xff]  ;;  %v422_v37 = vpack.c.bf16 %v374_v34, %v370_v33 }
  0xea   : > { %v427_v38 = vpack.c.bf16 %v383_v36, %v379_v35  ;;  %v3597_v33 = vld [vmem:[#allocation7 + $0x134] ss:$8 sps:$4 sm:$0xff]  }
  0xec   : > { %968 = vmatpush1.bf16.msra.mxu0 %v3517_v39  ;;  %v378_v39 = vld [vmem:[%s4225_s20 + $0x110] sm:$0xff] }
  0xed   : > { %969 = vmatprep.subr.bf16.mxu0 %v3522_v42  ;;  %v391_v42 = vld [vmem:[%s4225_s20 + $0x178] sm:$0xff]  ;;  %v426_v43 = vpack.c.bf16 %v382_v40, %v378_v39 }
  0xee   : > { %v431_v44 = vpack.c.bf16 %v391_v42, %v387_v41  ;;  %v3600_v41 = vld [vmem:[#allocation7 + $0x144] ss:$8 sps:$4 sm:$0xff]  }
  0xef   : > { %919 = vmatmul.mubr.bf16.gmra.mrb[20].mxu0 %v428_v48  ;;  %v399_v48 = vld [vmem:[%s4225_s20 + $0x1b8] sm:$0xff] }
  0xf0   : > { %970 = vmatpush1.bf16.msra.mxu0 %v3520_v47  ;;  %928 = vmatprep.mubr.bf16.mxu0 %v433_v51  ;;  %v395_v47 = vld [vmem:[%s4225_s20 + $0x198] sm:$0xff]  ;;  %v394_v51 = vld [vmem:[%s4225_s20 + $0x190] sm:$0xff] }
  0xf1   : > { %971 = vmatprep.subr.bf16.mxu0 %v3525_v49  ;;  %v430_v49 = vpack.c.bf16 %v390_v46, %v386_v45  ;;  %v435_v50 = vpack.c.bf16 %v399_v48, %v395_v47  ;;  %v434_v55 = vpack.c.bf16 %v398_v52, %v394_v51  ;;  %v3598_v46 = vld [vmem:[#allocation7 + $0x140] ss:$8 sps:$4 sm:$0xff]   ;;  %v3603_v47 = vld [vmem:[#allocation7 + $0x154] ss:$8 sps:$4 sm:$0xff]   ;;  %v3601_v51 = vld [vmem:[#allocation7 + $0x150] ss:$8 sps:$4 sm:$0xff]  }
  0xf4   : > { %972 = vmatpush1.bf16.msra.mxu0 %v3523_v53  ;;  %v403_v53 = vld [vmem:[%s4225_s20 + $0x1d8] sm:$0xff]  ;;  %s4632_s20 = scalar_lea.vmem [#allocation10], %s3025_s13 }
  0xf5   : > { %973 = vmatprep.subr.bf16.mxu0 %v3528_v56  ;;  %v439_v56 = vpack.c.bf16 %v407_v54, %v403_v53  ;;  %s2908_s9 = sshll.u32 %s4632_s20, 4  ;;  %s4699_s9 = int_to_ptr.vmem [resolvable:$true] %s2908_s9 }
  0xf6   : > { %s3892_s14 = scalar_lea.vmem %s4699_s9, 4096  ;;  %p3899_p12 = scmp.lt.s32.totalorder %s4699_s9, %s3897_s29 }
  0xf7   : > { %929 = vmatmul.mubr.bf16.gmra.mrb[24].mxu0 %v432_v62  ;;  %v3583_v62 = vld [vmem:[#allocation7 + $0xf4] ss:$8 sps:$4 sm:$0xff]   ;;  %p3893_p10 = scmp.ne.s32.totalorder %s4699_s9, %s3892_s14  ;;  %p3900_p1 = scmp.lt.s32.totalorder %s3898_s12, %s3892_s14 }
  0xf8   : > { %974 = vmatpush1.bf16.msra.mxu0 %v3526_v61  ;;  %938 = vmatprep.mubr.bf16.mxu0 %v437_v1  ;;  %v3582_v61 = vld [vmem:[#allocation7 + $0xe0] ss:$8 sps:$4 sm:$0xff]   ;;  %v506_v1 = vlaneseq }
  0xf9   : > { %975 = vmatprep.subr.bf16.mxu0 %v3531_v63  ;;  %1311 = vmatpush1.bf16.msra.mxu1 %v3582_v61  ;;  %v3585_v63 = vld [vmem:[#allocation7 + $0xf0] ss:$8 sps:$4 sm:$0xff]   ;;  %v3609_v61 = vld [vmem:[#allocation7 + $0x174] ss:$8 sps:$4 sm:$0xff]   ;;  %p3894_p3 = pnand %p3893_p10, %p4173_p5  ;;  %p3901_p2 = por %p3900_p1, %p3899_p12 }
  0xfa   : > { %1312 = vmatprep.subr.bf16.mxu1 %v3583_v62  ;;  %v507_v2 = vshrl.u32 %v506_v1, 7  ;;  %v3607_v1 = vld [vmem:[#allocation7 + $0x170] ss:$8 sps:$4 sm:$0xff]  }
  0xfb   : > { %p3895_p7 = pneg %p3894_p3 }
  0xfc   : > { %976 = vmatpush1.bf16.msra.mxu0 %v3529_v3  ;;  %v4303_v3 = vsub.s32 0, %v507_v2  ;;  %v4308_v5 = vsub.s32 1, %v507_v2 }
  0xfd   : > { %977 = vmatprep.subr.bf16.mxu0 %v3534_v6  ;;  %1313 = vmatpush1.bf16.msra.mxu1 %v3585_v63  ;;  %p3902_p4 = pnand %p3901_p2, %p3895_p7 }
  0xfe   : > { %1649 = vmatprep.subr.bf16.mxu1 %v3588_v0  ;;  %v4311_v6 = vrot.slane %v504_v4, %v4303_v3  ;;  %v4314_v8 = vrot.slane %v504_v4, %v4308_v5 }
  0xff   : > { %939 = vmatmul.mubr.bf16.gmra.mrb[28].mxu0 %v436_v11 }
 0x100   : > { %978 = vmatpush1.bf16.msra.mxu0 %v3532_v10  ;;  %981 = vmatprep.mubr.bf16.mxu0 %v411_v13 }
 0x101   : > { %979 = vmatprep.subr.bf16.mxu0 %v3537_v12 }
 0x104   : > { %980 = vmatpush1.bf16.msra.mxu0 %v3535_v14 }
 0x107   : > { %982 = vmatmul.mubr.bf16.vlgmr.msra.gmra.mrb[0].mxu0 %v410_v19  ;;  %v3591_v19 = vld [vmem:[#allocation7 + $0x114] ss:$8 sps:$4 sm:$0xff]  }
 0x108   : > { %991 = vmatprep.mubr.bf16.mxu0 %v415_v20 }
 0x10f   : > { %992 = vmatmul.mubr.bf16.gmra.mrb[4].mxu0 %v414_v25 }
 0x110   : > { %1001 = vmatprep.mubr.bf16.mxu0 %v419_v26 }
 0x117   : > { %1002 = vmatmul.mubr.bf16.gmra.mrb[8].mxu0 %v418_v31 }
 0x118   : > { %1011 = vmatprep.mubr.bf16.mxu0 %v423_v32  ;;  %v3592_v32 = vld [vmem:[#allocation7 + $0x120] ss:$8 sps:$4 sm:$0xff]  }
 0x11f   : > { %1012 = vmatmul.mubr.bf16.gmra.mrb[12].mxu0 %v422_v37  ;;  %v3595_v37 = vld [vmem:[#allocation7 + $0x130] ss:$8 sps:$4 sm:$0xff]  }
 0x120   : > { %1021 = vmatprep.mubr.bf16.mxu0 %v427_v38 }
 0x127   : > { %1022 = vmatmul.mubr.bf16.gmra.mrb[16].mxu0 %v426_v43 }
 0x128   : > { %1031 = vmatprep.mubr.bf16.mxu0 %v431_v44 }
 0x12f   : > { %1032 = vmatmul.mubr.bf16.gmra.mrb[20].mxu0 %v430_v49 }
 0x130   : > { %1041 = vmatprep.mubr.bf16.mxu0 %v435_v50 }
 0x137   : > { %1042 = vmatmul.mubr.bf16.gmra.mrb[24].mxu0 %v434_v55  ;;  %v3606_v55 = vld [vmem:[#allocation7 + $0x164] ss:$8 sps:$4 sm:$0xff]  }
 0x138   : > { %1051 = vmatprep.mubr.bf16.mxu0 %v439_v56 }
 0x13f   : > { %1052 = vmatmul.mubr.bf16.gmra.mrb[28].mxu0 %v438_v59 }
 0x1da   : > { %v983_v7 = vpop.f32.mrb[0].mxu0 }
 0x1db   : > { %v985_v9 = vpop.f32.mrb[1].mxu0  ;;  %v3295_v11 = vadd.f32 %v983_v7, %v4311_v6 }
 0x1dc   : > { %v987_v10 = vpop.f32.mrb[2].mxu0  ;;  %v3296_v14 = vadd.f32 %v985_v9, %v4314_v8  ;;  %v3612_v9 = vld [vmem:[#allocation7 + $0x184] ss:$8 sps:$4 sm:$0xff]  }
 0x1dd   : > { %v3297_v12 = vadd.f32 %v987_v10, %v4311_v6  ;;  %v989_v13 = vpop.f32.mrb[3].mxu0 }
 0x1de   : > { %v3298_v15 = vadd.f32 %v989_v13, %v4314_v8 }
 0x1df   : > { %v1062_v16 = vpack.c.bf16 %v3297_v12, %v3295_v11 }
 0x1e0   : > { %v1063_v17 = vpack.c.bf16 %v3298_v15, %v3296_v14  ;;  %v3610_v14 = vld [vmem:[#allocation7 + $0x180] ss:$8 sps:$4 sm:$0xff]   ;;  %v3615_v15 = vld [vmem:[#allocation7 + $0x194] ss:$8 sps:$4 sm:$0xff]  }
 0x1e2   : > { %v993_v20 = vpop.f32.mrb[4].mxu0  ;;  %1314 = vmatprep.mubr.bf16.mxu1 %v1063_v17 }
 0x1e3   : > { %v995_v21 = vpop.f32.mrb[5].mxu0  ;;  %1315 = vmatmul.mubr.bf16.vlgmr.msra.gmra.mrb[0].mxu1 %v1062_v16  ;;  %v3299_v24 = vadd.f32 %v993_v20, %v4311_v6 }
 0x1e4   : > { %v997_v22 = vpop.f32.mrb[6].mxu0  ;;  %1650 = vmatpush1.bf16.msra.mxu1 %v3586_v18  ;;  %v3300_v28 = vadd.f32 %v995_v21, %v4314_v8 }
 0x1e5   : > { %v3301_v25 = vadd.f32 %v997_v22, %v4311_v6  ;;  %v999_v26 = vpop.f32.mrb[7].mxu0  ;;  %1651 = vmatprep.subr.bf16.mxu1 %v3591_v19  ;;  %v3613_v19 = vld [vmem:[#allocation7 + $0x190] ss:$8 sps:$4 sm:$0xff]  }
 0x1e6   : > { %v3302_v29 = vadd.f32 %v999_v26, %v4314_v8 }
 0x1e7   : > { %v1064_v30 = vpack.c.bf16 %v3301_v25, %v3299_v24 }
 0x1e8   : > { %v1065_v31 = vpack.c.bf16 %v3302_v29, %v3300_v28  ;;  %1652 = vmatpush1.bf16.msra.mxu1 %v3589_v23  ;;  %v3618_v23 = vld [vmem:[#allocation7 + $0x1a4] ss:$8 sps:$4 sm:$0xff]   ;;  %v3616_v28 = vld [vmem:[#allocation7 + $0x1a0] ss:$8 sps:$4 sm:$0xff]   ;;  %v3621_v29 = vld [vmem:[#allocation7 + $0x1b4] ss:$8 sps:$4 sm:$0xff]  }
 0x1e9   : > { %1653 = vmatprep.subr.bf16.mxu1 %v3594_v27 }
 0x1ea   : > { %v1003_v34 = vpop.f32.mrb[8].mxu0  ;;  %1324 = vmatprep.mubr.bf16.mxu1 %v1065_v31 }
 0x1eb   : > { %v1005_v35 = vpop.f32.mrb[9].mxu0  ;;  %1325 = vmatmul.mubr.bf16.gmra.mrb[4].mxu1 %v1064_v30  ;;  %v3303_v38 = vadd.f32 %v1003_v34, %v4311_v6 }
 0x1ec   : > { %v1007_v36 = vpop.f32.mrb[10].mxu0  ;;  %1654 = vmatpush1.bf16.msra.mxu1 %v3592_v32  ;;  %v3304_v42 = vadd.f32 %v1005_v35, %v4314_v8 }
 0x1ed   : > { %v3305_v39 = vadd.f32 %v1007_v36, %v4311_v6  ;;  %v1009_v40 = vpop.f32.mrb[11].mxu0  ;;  %1655 = vmatprep.subr.bf16.mxu1 %v3597_v33  ;;  %v3619_v33 = vld [vmem:[#allocation7 + $0x1b0] ss:$8 sps:$4 sm:$0xff]  }
 0x1ee   : > { %v3306_v43 = vadd.f32 %v1009_v40, %v4314_v8 }
 0x1ef   : > { %v1066_v44 = vpack.c.bf16 %v3305_v39, %v3303_v38 }
 0x1f0   : > { %v1067_v45 = vpack.c.bf16 %v3306_v43, %v3304_v42  ;;  %1656 = vmatpush1.bf16.msra.mxu1 %v3595_v37  ;;  %v3624_v37 = vld [vmem:[#allocation7 + $0x1c4] ss:$8 sps:$4 sm:$0xff]   ;;  %v3622_v42 = vld [vmem:[#allocation7 + $0x1c0] ss:$8 sps:$4 sm:$0xff]   ;;  %v3627_v43 = vld [vmem:[#allocation7 + $0x1d4] ss:$8 sps:$4 sm:$0xff]  }
 0x1f1   : > { %1657 = vmatprep.subr.bf16.mxu1 %v3600_v41 }
 0x1f2   : > { %v1013_v48 = vpop.f32.mrb[12].mxu0  ;;  %1334 = vmatprep.mubr.bf16.mxu1 %v1067_v45 }
 0x1f3   : > { %v1015_v49 = vpop.f32.mrb[13].mxu0  ;;  %1335 = vmatmul.mubr.bf16.gmra.mrb[8].mxu1 %v1066_v44  ;;  %v3307_v52 = vadd.f32 %v1013_v48, %v4311_v6 }
 0x1f4   : > { %v1017_v50 = vpop.f32.mrb[14].mxu0  ;;  %1658 = vmatpush1.bf16.msra.mxu1 %v3598_v46  ;;  %v3308_v56 = vadd.f32 %v1015_v49, %v4314_v8 }
 0x1f5   : > { %v3309_v53 = vadd.f32 %v1017_v50, %v4311_v6  ;;  %v1019_v54 = vpop.f32.mrb[15].mxu0  ;;  %1659 = vmatprep.subr.bf16.mxu1 %v3603_v47  ;;  %v3625_v47 = vld [vmem:[#allocation7 + $0x1d0] ss:$8 sps:$4 sm:$0xff]  }
 0x1f6   : > { %v3310_v57 = vadd.f32 %v1019_v54, %v4314_v8 }
 0x1f7   : > { %v1068_v58 = vpack.c.bf16 %v3309_v53, %v3307_v52 }
 0x1f8   : > { %v1069_v59 = vpack.c.bf16 %v3310_v57, %v3308_v56  ;;  %1660 = vmatpush1.bf16.msra.mxu1 %v3601_v51  ;;  %v3628_v56 = vld [vmem:[#allocation7 + $0x1e0] ss:$8 sps:$4 sm:$0xff]   ;;  %v3633_v57 = vld [vmem:[#allocation7 + $0x1f4] ss:$8 sps:$4 sm:$0xff]  }
 0x1f9   : > { %1661 = vmatprep.subr.bf16.mxu1 %v3606_v55  ;;  %v3630_v55 = vld [vmem:[#allocation7 + $0x1e4] ss:$8 sps:$4 sm:$0xff]  }
 0x1fa   : > { %v1023_v62 = vpop.f32.mrb[16].mxu0  ;;  %1344 = vmatprep.mubr.bf16.mxu1 %v1069_v59  ;;  %v3636_v59 = vld [vmem:[#allocation7 + $0x204] ss:$8 sps:$4 sm:$0xff]  }
 0x1fb   : > { %v1025_v63 = vpop.f32.mrb[17].mxu0  ;;  %1345 = vmatmul.mubr.bf16.gmra.mrb[12].mxu1 %v1068_v58  ;;  %v3311_v2 = vadd.f32 %v1023_v62, %v4311_v6  ;;  %v3631_v58 = vld [vmem:[#allocation7 + $0x1f0] ss:$8 sps:$4 sm:$0xff]   ;;  %2016 = vmatprep.subr.bf16.mxu0 %v3636_v59  ;;  %v3640_v62 = vld [vmem:[#allocation7 + $0x220] ss:$8 sps:$4 sm:$0xff]  }
 0x1fc   : > { %v1027_v0 = vpop.f32.mrb[18].mxu0  ;;  %1662 = vmatpush1.bf16.msra.mxu1 %v3604_v60  ;;  %v3312_v10 = vadd.f32 %v1025_v63, %v4314_v8  ;;  %v3639_v60 = vld [vmem:[#allocation7 + $0x214] ss:$8 sps:$4 sm:$0xff]  }
 0x1fd   : > { %v3313_v4 = vadd.f32 %v1027_v0, %v4311_v6  ;;  %v1029_v7 = vpop.f32.mrb[19].mxu0  ;;  %1663 = vmatprep.subr.bf16.mxu1 %v3609_v61  ;;  %v3637_v61 = vld [vmem:[#allocation7 + $0x210] ss:$8 sps:$4 sm:$0xff]   ;;  %v3645_v63 = vld [vmem:[#allocation7 + $0x234] ss:$8 sps:$4 sm:$0xff]  }
 0x1fe   : > { %v3314_v11 = vadd.f32 %v1029_v7, %v4314_v8  ;;  %v3643_v0 = vld [vmem:[#allocation7 + $0x230] ss:$8 sps:$4 sm:$0xff]  }
 0x1ff   : > { %v1070_v12 = vpack.c.bf16 %v3313_v4, %v3311_v2  ;;  %v3646_v2 = vld [vmem:[#allocation7 + $0x240] ss:$8 sps:$4 sm:$0xff]   ;;  %v3651_v4 = vld [vmem:[#allocation7 + $0x254] ss:$8 sps:$4 sm:$0xff]   ;;  %v3649_v7 = vld [vmem:[#allocation7 + $0x250] ss:$8 sps:$4 sm:$0xff]  }
 0x200   : > { %v1071_v13 = vpack.c.bf16 %v3314_v11, %v3312_v10  ;;  %1664 = vmatpush1.bf16.msra.mxu1 %v3607_v1  ;;  %v3648_v1 = vld [vmem:[#allocation7 + $0x244] ss:$8 sps:$4 sm:$0xff]   ;;  %v3652_v10 = vld [vmem:[#allocation7 + $0x260] ss:$8 sps:$4 sm:$0xff]   ;;  %v3657_v11 = vld [vmem:[#allocation7 + $0x274] ss:$8 sps:$4 sm:$0xff]  }
 0x201   : > { %1665 = vmatprep.subr.bf16.mxu1 %v3612_v9  ;;  %v3654_v9 = vld [vmem:[#allocation7 + $0x264] ss:$8 sps:$4 sm:$0xff]  }
 0x202   : > { %v1033_v16 = vpop.f32.mrb[20].mxu0  ;;  %1354 = vmatprep.mubr.bf16.mxu1 %v1071_v13  ;;  %v3660_v13 = vld [vmem:[#allocation7 + $0x284] ss:$8 sps:$4 sm:$0xff]  }
 0x203   : > { %v1035_v17 = vpop.f32.mrb[21].mxu0  ;;  %1355 = vmatmul.mubr.bf16.gmra.mrb[16].mxu1 %v1070_v12  ;;  %v3315_v20 = vadd.f32 %v1033_v16, %v4311_v6  ;;  %v3655_v12 = vld [vmem:[#allocation7 + $0x270] ss:$8 sps:$4 sm:$0xff]  }
 0x204   : > { %v1037_v18 = vpop.f32.mrb[22].mxu0  ;;  %1666 = vmatpush1.bf16.msra.mxu1 %v3610_v14  ;;  %v3316_v24 = vadd.f32 %v1035_v17, %v4314_v8  ;;  %v3658_v14 = vld [vmem:[#allocation7 + $0x280] ss:$8 sps:$4 sm:$0xff]   ;;  %v3661_v16 = vld [vmem:[#allocation7 + $0x290] ss:$8 sps:$4 sm:$0xff]  }
 0x205   : > { %v3317_v21 = vadd.f32 %v1037_v18, %v4311_v6  ;;  %v1039_v22 = vpop.f32.mrb[23].mxu0  ;;  %1667 = vmatprep.subr.bf16.mxu1 %v3615_v15  ;;  %v3663_v15 = vld [vmem:[#allocation7 + $0x294] ss:$8 sps:$4 sm:$0xff]   ;;  %v3666_v17 = vld [vmem:[#allocation7 + $0x2a4] ss:$8 sps:$4 sm:$0xff]  }
 0x206   : > { %v3318_v25 = vadd.f32 %v1039_v22, %v4314_v8  ;;  %v3664_v18 = vld [vmem:[#allocation7 + $0x2a0] ss:$8 sps:$4 sm:$0xff]  }
 0x207   : > { %v1072_v26 = vpack.c.bf16 %v3317_v21, %v3315_v20  ;;  %v3667_v20 = vld [vmem:[#allocation7 + $0x2b0] ss:$8 sps:$4 sm:$0xff]   ;;  %v3672_v21 = vld [vmem:[#allocation7 + $0x2c4] ss:$8 sps:$4 sm:$0xff]   ;;  %v3670_v22 = vld [vmem:[#allocation7 + $0x2c0] ss:$8 sps:$4 sm:$0xff]  }
 0x208   : > { %v1073_v27 = vpack.c.bf16 %v3318_v25, %v3316_v24  ;;  %1668 = vmatpush1.bf16.msra.mxu1 %v3613_v19  ;;  %v3669_v19 = vld [vmem:[#allocation7 + $0x2b4] ss:$8 sps:$4 sm:$0xff]   ;;  %v3673_v24 = vld [vmem:[#allocation7 + $0x2d0] ss:$8 sps:$4 sm:$0xff]   ;;  %v1110_v25 = vld [vmem:[%s4751_s4] sm:$0x3] }
 0x209   : > { %1669 = vmatprep.subr.bf16.mxu1 %v3618_v23  ;;  %v3675_v23 = vld [vmem:[#allocation7 + $0x2d4] ss:$8 sps:$4 sm:$0xff]  }
 0x20a   : > { %v1043_v30 = vpop.f32.mrb[24].mxu0  ;;  %1364 = vmatprep.mubr.bf16.mxu1 %v1073_v27  ;;  %v4355_v27 = vrot.slane %v1110_v25, %v4308_v5 }
 0x20b   : > { %v1045_v31 = vpop.f32.mrb[25].mxu0  ;;  %1365 = vmatmul.mubr.bf16.gmra.mrb[20].mxu1 %v1072_v26  ;;  %v3319_v34 = vadd.f32 %v1043_v30, %v4311_v6  ;;  %v4352_v26 = vrot.slane %v1110_v25, %v4303_v3 }
 0x20c   : > { %v1047_v32 = vpop.f32.mrb[26].mxu0  ;;  %1670 = vmatpush1.bf16.msra.mxu1 %v3616_v28  ;;  %v3320_v38 = vadd.f32 %v1045_v31, %v4314_v8 }
 0x20d   : > { %v3321_v35 = vadd.f32 %v1047_v32, %v4311_v6  ;;  %v1049_v36 = vpop.f32.mrb[27].mxu0  ;;  %1671 = vmatprep.subr.bf16.mxu1 %v3621_v29 }
 0x20e   : > { %v3322_v39 = vadd.f32 %v1049_v36, %v4314_v8 }
 0x20f   : > { %v1074_v40 = vpack.c.bf16 %v3321_v35, %v3319_v34 }
 0x210   : > { %v1075_v41 = vpack.c.bf16 %v3322_v39, %v3320_v38  ;;  %1672 = vmatpush1.bf16.msra.mxu1 %v3619_v33 }
 0x211   : > { %1673 = vmatprep.subr.bf16.mxu1 %v3624_v37 }
 0x212   : > { %v1053_v44 = vpop.f32.mrb[28].mxu0  ;;  %1374 = vmatprep.mubr.bf16.mxu1 %v1075_v41 }
 0x213   : > { %v1055_v45 = vpop.f32.mrb[29].mxu0  ;;  %1375 = vmatmul.mubr.bf16.gmra.mrb[24].mxu1 %v1074_v40  ;;  %v3323_v48 = vadd.f32 %v1053_v44, %v4311_v6 }
 0x214   : > { %v1057_v46 = vpop.f32.mrb[30].mxu0  ;;  %1674 = vmatpush1.bf16.msra.mxu1 %v3622_v42  ;;  %v3324_v51 = vadd.f32 %v1055_v45, %v4314_v8 }
 0x215   : > { %v3325_v49 = vadd.f32 %v1057_v46, %v4311_v6  ;;  %v1059_v50 = vpop.f32.mrb[31].mxu0  ;;  %1675 = vmatprep.subr.bf16.mxu1 %v3627_v43  ;;  %v3634_v6 = vld [vmem:[#allocation7 + $0x200] ss:$8 sps:$4 sm:$0xff]  }
 0x216   : > { %v3326_v52 = vadd.f32 %v1059_v50, %v4314_v8  ;;  %2017 = vmatpush1.bf16.msra.mxu0 %v3634_v6  ;;  %v3642_v8 = vld [vmem:[#allocation7 + $0x224] ss:$8 sps:$4 sm:$0xff]  }
 0x217   : > { %v1076_v53 = vpack.c.bf16 %v3325_v49, %v3323_v48  ;;  %2018 = vmatprep.subr.bf16.mxu0 %v3639_v60 }
 0x218   : > { %v1077_v54 = vpack.c.bf16 %v3326_v52, %v3324_v51  ;;  %1676 = vmatpush1.bf16.msra.mxu1 %v3625_v47 }
 0x219   : > { %1677 = vmatprep.subr.bf16.mxu1 %v3630_v55 }
 0x21a   : > { %1384 = vmatprep.mubr.bf16.mxu1 %v1077_v54  ;;  %2019 = vmatpush1.bf16.msra.mxu0 %v3637_v61 }
 0x21b   : > { %1385 = vmatmul.mubr.bf16.gmra.mrb[28].mxu1 %v1076_v53  ;;  %2020 = vmatprep.subr.bf16.mxu0 %v3642_v8 }
 0x21c   : > { %1678 = vmatpush1.bf16.msra.mxu1 %v3628_v56 }
 0x21d   : > { %1679 = vmatprep.subr.bf16.mxu1 %v3633_v57 }
 0x21e   : > { %2021 = vmatpush1.bf16.msra.mxu0 %v3640_v62 }
 0x21f   : > { %2022 = vmatprep.subr.bf16.mxu0 %v3645_v63 }
 0x220   : > { %1680 = vmatpush1.bf16.msra.mxu1 %v3631_v58 }
 0x222   : > { %2023 = vmatpush1.bf16.msra.mxu0 %v3643_v0 }
 0x223   : > { %2024 = vmatprep.subr.bf16.mxu0 %v3648_v1 }
 0x226   : > { %2025 = vmatpush1.bf16.msra.mxu0 %v3646_v2 }
 0x227   : > { %2026 = vmatprep.subr.bf16.mxu0 %v3651_v4 }
 0x22a   : > { %2027 = vmatpush1.bf16.msra.mxu0 %v3649_v7 }
 0x22b   : > { %2028 = vmatprep.subr.bf16.mxu0 %v3654_v9 }
 0x22e   : > { %2029 = vmatpush1.bf16.msra.mxu0 %v3652_v10 }
 0x22f   : > { %2030 = vmatprep.subr.bf16.mxu0 %v3657_v11 }
 0x232   : > { %2031 = vmatpush1.bf16.msra.mxu0 %v3655_v12 }
 0x233   : > { %2032 = vmatprep.subr.bf16.mxu0 %v3660_v13 }
 0x236   : > { %2033 = vmatpush1.bf16.msra.mxu0 %v3658_v14 }
 0x237   : > { %2034 = vmatprep.subr.bf16.mxu0 %v3663_v15 }
 0x23a   : > { %2035 = vmatpush1.bf16.msra.mxu0 %v3661_v16 }
 0x23b   : > { %2036 = vmatprep.subr.bf16.mxu0 %v3666_v17 }
 0x23e   : > { %2037 = vmatpush1.bf16.msra.mxu0 %v3664_v18 }
 0x23f   : > { %2038 = vmatprep.subr.bf16.mxu0 %v3669_v19 }
 0x242   : > { %2039 = vmatpush1.bf16.msra.mxu0 %v3667_v20 }
 0x243   : > { %2040 = vmatprep.subr.bf16.mxu0 %v3672_v21 }
 0x246   : > { %2041 = vmatpush1.bf16.msra.mxu0 %v3670_v22 }
 0x247   : > { %2042 = vmatprep.subr.bf16.mxu0 %v3675_v23 }
 0x24a   : > { %2043 = vmatpush1.bf16.msra.mxu0 %v3673_v24 }
 0x2b6   : > { %v1316_v28 = vpop.f32.mrb[0].mxu1 }
 0x2b7   : > { %v1317_v29 = vadd.f32 %v1316_v28, %v4352_v26  ;;  %v1318_v30 = vpop.f32.mrb[1].mxu1 }
 0x2b8   : > { %v1319_v31 = vadd.f32 %v1318_v30, %v4355_v27  ;;  %v1320_v32 = vpop.f32.mrb[2].mxu1 }
 0x2b9   : > { %v1321_v33 = vadd.f32 %v1320_v32, %v4352_v26  ;;  %v1322_v34 = vpop.f32.mrb[3].mxu1  ;;  %v1395_v36 = vmax.f32 %v1317_v29, 0.0 }
 0x2ba   : > { %v1323_v35 = vadd.f32 %v1322_v34, %v4355_v27  ;;  %v1396_v38 = vmax.f32 %v1319_v31, 0.0 }
 0x2bb   : > { %v1397_v37 = vmax.f32 %v1321_v33, 0.0 }
 0x2bc   : > { %v1398_v39 = vmax.f32 %v1323_v35, 0.0 }
 0x2bd   : > { %v1427_v40 = vpack.c.bf16 %v1397_v37, %v1395_v36 }
 0x2be   : > { %v1428_v41 = vpack.c.bf16 %v1398_v39, %v1396_v38  ;;  %v1326_v42 = vpop.f32.mrb[4].mxu1 }
 0x2bf   : > { %v1327_v43 = vadd.f32 %v1326_v42, %v4352_v26  ;;  %v1328_v44 = vpop.f32.mrb[5].mxu1 }
 0x2c0   : > { %v1329_v45 = vadd.f32 %v1328_v44, %v4355_v27  ;;  %v1330_v46 = vpop.f32.mrb[6].mxu1  ;;  %1681 = vmatprep.mubr.bf16.mxu1 %v1428_v41 }
 0x2c1   : > { %v1331_v47 = vadd.f32 %v1330_v46, %v4352_v26  ;;  %v1332_v48 = vpop.f32.mrb[7].mxu1  ;;  %1682 = vmatmul.mubr.bf16.vlgmr.msra.gmra.mrb[32].mxu1 %v1427_v40  ;;  %v1399_v50 = vmax.f32 %v1327_v43, 0.0 }
 0x2c2   : > { %v1333_v49 = vadd.f32 %v1332_v48, %v4355_v27  ;;  %v1400_v52 = vmax.f32 %v1329_v45, 0.0 }
 0x2c3   : > { %v1401_v51 = vmax.f32 %v1331_v47, 0.0 }
 0x2c4   : > { %v1402_v53 = vmax.f32 %v1333_v49, 0.0 }
 0x2c5   : > { %v1429_v54 = vpack.c.bf16 %v1401_v51, %v1399_v50 }
 0x2c6   : > { %v1430_v55 = vpack.c.bf16 %v1402_v53, %v1400_v52  ;;  %v1336_v56 = vpop.f32.mrb[8].mxu1 }
 0x2c7   : > { %v1337_v57 = vadd.f32 %v1336_v56, %v4352_v26  ;;  %v1338_v58 = vpop.f32.mrb[9].mxu1 }
 0x2c8   : > { %v1339_v6 = vadd.f32 %v1338_v58, %v4355_v27  ;;  %v1340_v59 = vpop.f32.mrb[10].mxu1  ;;  %1691 = vmatprep.mubr.bf16.mxu1 %v1430_v55 }
 0x2c9   : > { %v1341_v60 = vadd.f32 %v1340_v59, %v4352_v26  ;;  %v1342_v61 = vpop.f32.mrb[11].mxu1  ;;  %1692 = vmatmul.mubr.bf16.gmra.mrb[36].mxu1 %v1429_v54  ;;  %v1403_v62 = vmax.f32 %v1337_v57, 0.0 }
 0x2ca   : > { %v1343_v8 = vadd.f32 %v1342_v61, %v4355_v27  ;;  %v1404_v0 = vmax.f32 %v1339_v6, 0.0 }
 0x2cb   : > { %v1405_v63 = vmax.f32 %v1341_v60, 0.0 }
 0x2cc   : > { %v1406_v1 = vmax.f32 %v1343_v8, 0.0 }
 0x2cd   : > { %v1431_v2 = vpack.c.bf16 %v1405_v63, %v1403_v62 }
 0x2ce   : > { %v1432_v4 = vpack.c.bf16 %v1406_v1, %v1404_v0  ;;  %v1346_v7 = vpop.f32.mrb[12].mxu1 }
 0x2cf   : > { %v1347_v9 = vadd.f32 %v1346_v7, %v4352_v26  ;;  %v1348_v10 = vpop.f32.mrb[13].mxu1 }
 0x2d0   : > { %v1349_v11 = vadd.f32 %v1348_v10, %v4355_v27  ;;  %v1350_v12 = vpop.f32.mrb[14].mxu1  ;;  %1701 = vmatprep.mubr.bf16.mxu1 %v1432_v4 }
 0x2d1   : > { %v1351_v13 = vadd.f32 %v1350_v12, %v4352_v26  ;;  %v1352_v14 = vpop.f32.mrb[15].mxu1  ;;  %1702 = vmatmul.mubr.bf16.gmra.mrb[40].mxu1 %v1431_v2  ;;  %v1407_v16 = vmax.f32 %v1347_v9, 0.0 }
 0x2d2   : > { %v1353_v15 = vadd.f32 %v1352_v14, %v4355_v27  ;;  %v1408_v18 = vmax.f32 %v1349_v11, 0.0 }
 0x2d3   : > { %v1409_v17 = vmax.f32 %v1351_v13, 0.0 }
 0x2d4   : > { %v1410_v19 = vmax.f32 %v1353_v15, 0.0 }
 0x2d5   : > { %v1433_v20 = vpack.c.bf16 %v1409_v17, %v1407_v16 }
 0x2d6   : > { %v1434_v21 = vpack.c.bf16 %v1410_v19, %v1408_v18  ;;  %v1356_v22 = vpop.f32.mrb[16].mxu1  ;;  %v3678_v18 = vld [vmem:[#allocation7 + $0x2e4] ss:$8 sps:$4 sm:$0xff]   ;;  %v3676_v19 = vld [vmem:[#allocation7 + $0x2e0] ss:$8 sps:$4 sm:$0xff]  }
 0x2d7   : > { %v1357_v23 = vadd.f32 %v1356_v22, %v4352_v26  ;;  %v1358_v24 = vpop.f32.mrb[17].mxu1  ;;  %2044 = vmatprep.subr.bf16.mxu0 %v3678_v18  ;;  %v3684_v22 = vld [vmem:[#allocation7 + $0x304] ss:$8 sps:$4 sm:$0xff]  }
 0x2d8   : > { %v1359_v25 = vadd.f32 %v1358_v24, %v4355_v27  ;;  %v1360_v28 = vpop.f32.mrb[18].mxu1  ;;  %1711 = vmatprep.mubr.bf16.mxu1 %v1434_v21  ;;  %2045 = vmatpush1.bf16.msra.mxu0 %v3676_v19  ;;  %v3679_v21 = vld [vmem:[#allocation7 + $0x2f0] ss:$8 sps:$4 sm:$0xff]   ;;  %v3690_v24 = vld [vmem:[#allocation7 + $0x324] ss:$8 sps:$4 sm:$0xff]  }
 0x2d9   : > { %v1361_v29 = vadd.f32 %v1360_v28, %v4352_v26  ;;  %v1362_v30 = vpop.f32.mrb[19].mxu1  ;;  %1712 = vmatmul.mubr.bf16.gmra.mrb[44].mxu1 %v1433_v20  ;;  %v1411_v32 = vmax.f32 %v1357_v23, 0.0  ;;  %v3681_v20 = vld [vmem:[#allocation7 + $0x2f4] ss:$8 sps:$4 sm:$0xff]   ;;  %2383 = vmatprep.subr.bf16.mxu1 %v3684_v22 }
 0x2da   : > { %v1363_v31 = vadd.f32 %v1362_v30, %v4355_v27  ;;  %v1412_v34 = vmax.f32 %v1359_v25, 0.0  ;;  %2046 = vmatprep.subr.bf16.mxu0 %v3681_v20  ;;  %v3687_v23 = vld [vmem:[#allocation7 + $0x314] ss:$8 sps:$4 sm:$0xff]   ;;  %v3688_v25 = vld [vmem:[#allocation7 + $0x320] ss:$8 sps:$4 sm:$0xff]  }
 0x2db   : > { %v1413_v33 = vmax.f32 %v1361_v29, 0.0  ;;  %v3693_v28 = vld [vmem:[#allocation7 + $0x334] ss:$8 sps:$4 sm:$0xff]   ;;  %v3691_v29 = vld [vmem:[#allocation7 + $0x330] ss:$8 sps:$4 sm:$0xff]  }
 0x2dc   : > { %v1414_v35 = vmax.f32 %v1363_v31, 0.0  ;;  %2047 = vmatpush1.bf16.msra.mxu0 %v3679_v21  ;;  %v3696_v30 = vld [vmem:[#allocation7 + $0x344] ss:$8 sps:$4 sm:$0xff]   ;;  %v3694_v31 = vld [vmem:[#allocation7 + $0x340] ss:$8 sps:$4 sm:$0xff]  }
 0x2dd   : > { %v1435_v36 = vpack.c.bf16 %v1413_v33, %v1411_v32  ;;  %v3699_v32 = vld [vmem:[#allocation7 + $0x354] ss:$8 sps:$4 sm:$0xff]   ;;  %v3697_v33 = vld [vmem:[#allocation7 + $0x350] ss:$8 sps:$4 sm:$0xff]  }
 0x2de   : > { %v1436_v37 = vpack.c.bf16 %v1414_v35, %v1412_v34  ;;  %v1366_v38 = vpop.f32.mrb[20].mxu1  ;;  %v3702_v34 = vld [vmem:[#allocation7 + $0x364] ss:$8 sps:$4 sm:$0xff]   ;;  %v3700_v35 = vld [vmem:[#allocation7 + $0x360] ss:$8 sps:$4 sm:$0xff]  }
 0x2df   : > { %v1367_v39 = vadd.f32 %v1366_v38, %v4352_v26  ;;  %v1368_v40 = vpop.f32.mrb[21].mxu1  ;;  %v3708_v38 = vld [vmem:[#allocation7 + $0x384] ss:$8 sps:$4 sm:$0xff]  }
 0x2e0   : > { %v1369_v41 = vadd.f32 %v1368_v40, %v4355_v27  ;;  %v1370_v42 = vpop.f32.mrb[22].mxu1  ;;  %1721 = vmatprep.mubr.bf16.mxu1 %v1436_v37  ;;  %v3703_v37 = vld [vmem:[#allocation7 + $0x370] ss:$8 sps:$4 sm:$0xff]   ;;  %v3711_v40 = vld [vmem:[#allocation7 + $0x394] ss:$8 sps:$4 sm:$0xff]  }
 0x2e1   : > { %v1371_v43 = vadd.f32 %v1370_v42, %v4352_v26  ;;  %v1372_v44 = vpop.f32.mrb[23].mxu1  ;;  %1722 = vmatmul.mubr.bf16.gmra.mrb[48].mxu1 %v1435_v36  ;;  %v1415_v46 = vmax.f32 %v1367_v39, 0.0  ;;  %v3705_v36 = vld [vmem:[#allocation7 + $0x374] ss:$8 sps:$4 sm:$0xff]   ;;  %v3706_v39 = vld [vmem:[#allocation7 + $0x380] ss:$8 sps:$4 sm:$0xff]  }
 0x2e2   : > { %v1373_v45 = vadd.f32 %v1372_v44, %v4355_v27  ;;  %v1416_v48 = vmax.f32 %v1369_v41, 0.0  ;;  %v3709_v41 = vld [vmem:[#allocation7 + $0x390] ss:$8 sps:$4 sm:$0xff]   ;;  %v3714_v42 = vld [vmem:[#allocation7 + $0x3a4] ss:$8 sps:$4 sm:$0xff]  }
 0x2e3   : > { %v1417_v47 = vmax.f32 %v1371_v43, 0.0  ;;  %v3712_v43 = vld [vmem:[#allocation7 + $0x3a0] ss:$8 sps:$4 sm:$0xff]   ;;  %v3717_v44 = vld [vmem:[#allocation7 + $0x3b4] ss:$8 sps:$4 sm:$0xff]  }
 0x2e4   : > { %v1418_v49 = vmax.f32 %v1373_v45, 0.0  ;;  %v3715_v45 = vld [vmem:[#allocation7 + $0x3b0] ss:$8 sps:$4 sm:$0xff]  }
 0x2e5   : > { %v1437_v50 = vpack.c.bf16 %v1417_v47, %v1415_v46  ;;  %v3720_v46 = vld [vmem:[#allocation7 + $0x3c4] ss:$8 sps:$4 sm:$0xff]   ;;  %v3718_v47 = vld [vmem:[#allocation7 + $0x3c0] ss:$8 sps:$4 sm:$0xff]  }
 0x2e6   : > { %v1438_v51 = vpack.c.bf16 %v1418_v49, %v1416_v48  ;;  %v1376_v52 = vpop.f32.mrb[24].mxu1  ;;  %v3723_v48 = vld [vmem:[#allocation7 + $0x3d4] ss:$8 sps:$4 sm:$0xff]   ;;  %v3721_v49 = vld [vmem:[#allocation7 + $0x3d0] ss:$8 sps:$4 sm:$0xff]  }
 0x2e7   : > { %v1377_v53 = vadd.f32 %v1376_v52, %v4352_v26  ;;  %v1378_v54 = vpop.f32.mrb[25].mxu1 }
 0x2e8   : > { %v1379_v55 = vadd.f32 %v1378_v54, %v4355_v27  ;;  %v1380_v56 = vpop.f32.mrb[26].mxu1  ;;  %1731 = vmatprep.mubr.bf16.mxu1 %v1438_v51 }
 0x2e9   : > { %v1381_v57 = vadd.f32 %v1380_v56, %v4352_v26  ;;  %v1382_v58 = vpop.f32.mrb[27].mxu1  ;;  %1732 = vmatmul.mubr.bf16.gmra.mrb[52].mxu1 %v1437_v50  ;;  %v1419_v59 = vmax.f32 %v1377_v53, 0.0  ;;  %v3122_v50 = vld [vmem:[%s4751_s4 + $0x2] sm:$0x3] }
 0x2ea   : > { %v1383_v6 = vadd.f32 %v1382_v58, %v4355_v27  ;;  %v1420_v61 = vmax.f32 %v1379_v55, 0.0  ;;  %v4393_v51 = vrot.slane %v3122_v50, %v4303_v3  ;;  %v4396_v52 = vrot.slane %v3122_v50, %v4308_v5 }
 0x2eb   : > { %v1421_v60 = vmax.f32 %v1381_v57, 0.0 }
 0x2ec   : > { %v1422_v8 = vmax.f32 %v1383_v6, 0.0 }
 0x2ed   : > { %v1439_v62 = vpack.c.bf16 %v1421_v60, %v1419_v59 }
 0x2ee   : > { %v1440_v63 = vpack.c.bf16 %v1422_v8, %v1420_v61  ;;  %v1386_v0 = vpop.f32.mrb[28].mxu1 }
 0x2ef   : > { %v1387_v1 = vadd.f32 %v1386_v0, %v4352_v26  ;;  %v1388_v2 = vpop.f32.mrb[29].mxu1 }
 0x2f0   : > { %v1389_v4 = vadd.f32 %v1388_v2, %v4355_v27  ;;  %v1390_v7 = vpop.f32.mrb[30].mxu1  ;;  %1741 = vmatprep.mubr.bf16.mxu1 %v1440_v63 }
 0x2f1   : > { %v1391_v9 = vadd.f32 %v1390_v7, %v4352_v26  ;;  %v1392_v10 = vpop.f32.mrb[31].mxu1  ;;  %1742 = vmatmul.mubr.bf16.gmra.mrb[56].mxu1 %v1439_v62  ;;  %v1423_v12 = vmax.f32 %v1387_v1, 0.0  ;;  %v3682_v26 = vld [vmem:[#allocation7 + $0x300] ss:$8 sps:$4 sm:$0xff]  }
 0x2f2   : > { %v1393_v11 = vadd.f32 %v1392_v10, %v4355_v27  ;;  %v1424_v14 = vmax.f32 %v1389_v4, 0.0  ;;  %2384 = vmatpush1.bf16.msra.mxu1 %v3682_v26  ;;  %v3685_v27 = vld [vmem:[#allocation7 + $0x310] ss:$8 sps:$4 sm:$0xff]  }
 0x2f3   : > { %v1425_v13 = vmax.f32 %v1391_v9, 0.0  ;;  %2385 = vmatprep.subr.bf16.mxu1 %v3687_v23 }
 0x2f4   : > { %v1426_v15 = vmax.f32 %v1393_v11, 0.0 }
 0x2f5   : > { %v1441_v16 = vpack.c.bf16 %v1425_v13, %v1423_v12 }
 0x2f6   : > { %v1442_v17 = vpack.c.bf16 %v1426_v15, %v1424_v14  ;;  %2386 = vmatpush1.bf16.msra.mxu1 %v3685_v27 }
 0x2f7   : > { %2387 = vmatprep.subr.bf16.mxu1 %v3690_v24 }
 0x2f8   : > { %1751 = vmatprep.mubr.bf16.mxu1 %v1442_v17 }
 0x2f9   : > { %1752 = vmatmul.mubr.bf16.gmra.mrb[60].mxu1 %v1441_v16 }
 0x2fa   : > { %2388 = vmatpush1.bf16.msra.mxu1 %v3688_v25 }
 0x2fb   : > { %2389 = vmatprep.subr.bf16.mxu1 %v3693_v28 }
 0x2fe   : > { %2390 = vmatpush1.bf16.msra.mxu1 %v3691_v29 }
 0x2ff   : > { %2391 = vmatprep.subr.bf16.mxu1 %v3696_v30 }
 0x302   : > { %2392 = vmatpush1.bf16.msra.mxu1 %v3694_v31 }
 0x303   : > { %2393 = vmatprep.subr.bf16.mxu1 %v3699_v32 }
 0x306   : > { %2394 = vmatpush1.bf16.msra.mxu1 %v3697_v33 }
 0x307   : > { %2395 = vmatprep.subr.bf16.mxu1 %v3702_v34 }
 0x30a   : > { %2396 = vmatpush1.bf16.msra.mxu1 %v3700_v35 }
 0x30b   : > { %2397 = vmatprep.subr.bf16.mxu1 %v3705_v36 }
 0x30e   : > { %2398 = vmatpush1.bf16.msra.mxu1 %v3703_v37 }
 0x30f   : > { %2399 = vmatprep.subr.bf16.mxu1 %v3708_v38 }
 0x312   : > { %2400 = vmatpush1.bf16.msra.mxu1 %v3706_v39 }
 0x313   : > { %2401 = vmatprep.subr.bf16.mxu1 %v3711_v40 }
 0x316   : > { %2402 = vmatpush1.bf16.msra.mxu1 %v3709_v41 }
 0x317   : > { %2403 = vmatprep.subr.bf16.mxu1 %v3714_v42 }
 0x31a   : > { %2404 = vmatpush1.bf16.msra.mxu1 %v3712_v43 }
 0x31b   : > { %2405 = vmatprep.subr.bf16.mxu1 %v3717_v44 }
 0x31e   : > { %2406 = vmatpush1.bf16.msra.mxu1 %v3715_v45 }
 0x31f   : > { %2407 = vmatprep.subr.bf16.mxu1 %v3720_v46 }
 0x322   : > { %2408 = vmatpush1.bf16.msra.mxu1 %v3718_v47 }
 0x323   : > { %2409 = vmatprep.subr.bf16.mxu1 %v3723_v48 }
 0x326   : > { %2410 = vmatpush1.bf16.msra.mxu1 %v3721_v49 }
 0x394   : > { %v1683_v53 = vpop.f32.mrb[32].mxu1 }
 0x395   : > { %v1684_v54 = vadd.f32 %v1683_v53, %v4393_v51  ;;  %v1685_v55 = vpop.f32.mrb[33].mxu1 }
 0x396   : > { %v1686_v56 = vadd.f32 %v1685_v55, %v4396_v52  ;;  %v1687_v57 = vpop.f32.mrb[34].mxu1 }
 0x397   : > { %v1688_v58 = vadd.f32 %v1687_v57, %v4393_v51  ;;  %v1689_v6 = vpop.f32.mrb[35].mxu1  ;;  %v1762_v60 = vmax.f32 %v1684_v54, 0.0 }
 0x398   : > { %v1690_v59 = vadd.f32 %v1689_v6, %v4396_v52  ;;  %v1763_v8 = vmax.f32 %v1686_v56, 0.0 }
 0x399   : > { %v1764_v61 = vmax.f32 %v1688_v58, 0.0 }
 0x39a   : > { %v1765_v62 = vmax.f32 %v1690_v59, 0.0 }
 0x39b   : > { %v1794_v63 = vpack.c.bf16 %v1764_v61, %v1762_v60 }
 0x39c   : > { %v1795_v0 = vpack.c.bf16 %v1765_v62, %v1763_v8  ;;  %v1693_v1 = vpop.f32.mrb[36].mxu1 }
 0x39d   : > { %v1694_v2 = vadd.f32 %v1693_v1, %v4393_v51  ;;  %v1695_v4 = vpop.f32.mrb[37].mxu1 }
 0x39e   : > { %v1696_v7 = vadd.f32 %v1695_v4, %v4396_v52  ;;  %v1697_v9 = vpop.f32.mrb[38].mxu1  ;;  %2048 = vmatprep.mubr.bf16.mxu0 %v1795_v0 }
 0x39f   : > { %v1698_v10 = vadd.f32 %v1697_v9, %v4393_v51  ;;  %v1699_v11 = vpop.f32.mrb[39].mxu1  ;;  %2049 = vmatmul.mubr.bf16.vlgmr.msra.gmra.mrb[32].mxu0 %v1794_v63  ;;  %v1766_v13 = vmax.f32 %v1694_v2, 0.0 }
 0x3a0   : > { %v1700_v12 = vadd.f32 %v1699_v11, %v4396_v52  ;;  %v1767_v15 = vmax.f32 %v1696_v7, 0.0 }
 0x3a1   : > { %v1768_v14 = vmax.f32 %v1698_v10, 0.0 }
 0x3a2   : > { %v1769_v16 = vmax.f32 %v1700_v12, 0.0 }
 0x3a3   : > { %v1796_v17 = vpack.c.bf16 %v1768_v14, %v1766_v13 }
 0x3a4   : > { %v1797_v18 = vpack.c.bf16 %v1769_v16, %v1767_v15  ;;  %v1703_v19 = vpop.f32.mrb[40].mxu1 }
 0x3a5   : > { %v1704_v20 = vadd.f32 %v1703_v19, %v4393_v51  ;;  %v1705_v21 = vpop.f32.mrb[41].mxu1 }
 0x3a6   : > { %v1706_v26 = vadd.f32 %v1705_v21, %v4396_v52  ;;  %v1707_v22 = vpop.f32.mrb[42].mxu1  ;;  %2058 = vmatprep.mubr.bf16.mxu0 %v1797_v18 }
 0x3a7   : > { %v1708_v23 = vadd.f32 %v1707_v22, %v4393_v51  ;;  %v1709_v27 = vpop.f32.mrb[43].mxu1  ;;  %2059 = vmatmul.mubr.bf16.gmra.mrb[36].mxu0 %v1796_v17  ;;  %v1770_v25 = vmax.f32 %v1704_v20, 0.0 }
 0x3a8   : > { %v1710_v24 = vadd.f32 %v1709_v27, %v4396_v52  ;;  %v1771_v29 = vmax.f32 %v1706_v26, 0.0 }
 0x3a9   : > { %v1772_v28 = vmax.f32 %v1708_v23, 0.0 }
 0x3aa   : > { %v1773_v30 = vmax.f32 %v1710_v24, 0.0 }
 0x3ab   : > { %v1798_v31 = vpack.c.bf16 %v1772_v28, %v1770_v25 }
 0x3ac   : > { %v1799_v32 = vpack.c.bf16 %v1773_v30, %v1771_v29  ;;  %v1713_v33 = vpop.f32.mrb[44].mxu1 }
 0x3ad   : > { %v1714_v34 = vadd.f32 %v1713_v33, %v4393_v51  ;;  %v1715_v35 = vpop.f32.mrb[45].mxu1 }
 0x3ae   : > { %v1716_v36 = vadd.f32 %v1715_v35, %v4396_v52  ;;  %v1717_v37 = vpop.f32.mrb[46].mxu1  ;;  %2068 = vmatprep.mubr.bf16.mxu0 %v1799_v32 }
 0x3af   : > { %v1718_v38 = vadd.f32 %v1717_v37, %v4393_v51  ;;  %v1719_v39 = vpop.f32.mrb[47].mxu1  ;;  %2069 = vmatmul.mubr.bf16.gmra.mrb[40].mxu0 %v1798_v31  ;;  %v1774_v41 = vmax.f32 %v1714_v34, 0.0 }
 0x3b0   : > { %v1720_v40 = vadd.f32 %v1719_v39, %v4396_v52  ;;  %v1775_v43 = vmax.f32 %v1716_v36, 0.0 }
 0x3b1   : > { %v1776_v42 = vmax.f32 %v1718_v38, 0.0 }
 0x3b2   : > { %v1777_v44 = vmax.f32 %v1720_v40, 0.0 }
 0x3b3   : > { %v1800_v45 = vpack.c.bf16 %v1776_v42, %v1774_v41 }
 0x3b4   : > { %v1801_v46 = vpack.c.bf16 %v1777_v44, %v1775_v43  ;;  %v1723_v47 = vpop.f32.mrb[48].mxu1  ;;  %v3726_v43 = vld [vmem:[#allocation7 + $0x3e4] ss:$8 sps:$4 sm:$0xff]   ;;  %v3724_v44 = vld [vmem:[#allocation7 + $0x3e0] ss:$8 sps:$4 sm:$0xff]  }
 0x3b5   : > { %v1724_v48 = vadd.f32 %v1723_v47, %v4393_v51  ;;  %v1725_v49 = vpop.f32.mrb[49].mxu1  ;;  %2411 = vmatprep.subr.bf16.mxu1 %v3726_v43  ;;  %v3732_v47 = vld [vmem:[#allocation8 + $0x4] ss:$8 sps:$4 sm:$0xff]  }
 0x3b6   : > { %v1726_v50 = vadd.f32 %v1725_v49, %v4396_v52  ;;  %v1727_v53 = vpop.f32.mrb[50].mxu1  ;;  %2078 = vmatprep.mubr.bf16.mxu0 %v1801_v46  ;;  %2412 = vmatpush1.bf16.msra.mxu1 %v3724_v44  ;;  %v3727_v46 = vld [vmem:[#allocation7 + $0x3f0] ss:$8 sps:$4 sm:$0xff]   ;;  %v4438_v49 = vld [vmem:[#allocation8 + $0x24] ss:$8 sps:$4 sm:$0xff]  }
 0x3b7   : > { %v1728_v54 = vadd.f32 %v1727_v53, %v4393_v51  ;;  %v1729_v55 = vpop.f32.mrb[51].mxu1  ;;  %2079 = vmatmul.mubr.bf16.gmra.mrb[44].mxu0 %v1800_v45  ;;  %v1778_v57 = vmax.f32 %v1724_v48, 0.0  ;;  %v3729_v45 = vld [vmem:[#allocation7 + $0x3f4] ss:$8 sps:$4 sm:$0xff]   ;;  %2748 = vmatprep.subr.bf16.mxu0 %v3732_v47  ;;  %v4435_v48 = vld [vmem:[#allocation8 + $0x10] ss:$8 sps:$4 sm:$0xff]  }
 0x3b8   : > { %v1730_v56 = vadd.f32 %v1729_v55, %v4396_v52  ;;  %v1779_v6 = vmax.f32 %v1726_v50, 0.0  ;;  %2413 = vmatprep.subr.bf16.mxu1 %v3729_v45  ;;  %v4441_v50 = vld [vmem:[#allocation8 + $0x20] ss:$8 sps:$4 sm:$0xff]   ;;  %v4444_v53 = vld [vmem:[#allocation8 + $0x34] ss:$8 sps:$4 sm:$0xff]  }
 0x3b9   : > { %v1780_v58 = vmax.f32 %v1728_v54, 0.0  ;;  %v4447_v54 = vld [vmem:[#allocation8 + $0x30] ss:$8 sps:$4 sm:$0xff]   ;;  %v4450_v55 = vld [vmem:[#allocation8 + $0x44] ss:$8 sps:$4 sm:$0xff]  }
 0x3ba   : > { %v1781_v59 = vmax.f32 %v1730_v56, 0.0  ;;  %2414 = vmatpush1.bf16.msra.mxu1 %v3727_v46  ;;  %v4453_v56 = vld [vmem:[#allocation8 + $0x40] ss:$8 sps:$4 sm:$0xff]  }
 0x3bb   : > { %v1802_v60 = vpack.c.bf16 %v1780_v58, %v1778_v57  ;;  %3263 = vmatprep.subr.bf16.mxu1 %v3732_v47  ;;  %v4456_v57 = vld [vmem:[#allocation8 + $0x54] ss:$8 sps:$4 sm:$0xff]   ;;  %v4459_v58 = vld [vmem:[#allocation8 + $0x50] ss:$8 sps:$4 sm:$0xff]  }
 0x3bc   : > { %v1803_v61 = vpack.c.bf16 %v1781_v59, %v1779_v6  ;;  %v1733_v8 = vpop.f32.mrb[52].mxu1  ;;  %v4462_v6 = vld [vmem:[#allocation8 + $0x64] ss:$8 sps:$4 sm:$0xff]   ;;  %v4465_v59 = vld [vmem:[#allocation8 + $0x60] ss:$8 sps:$4 sm:$0xff]  }
 0x3bd   : > { %v1734_v62 = vadd.f32 %v1733_v8, %v4393_v51  ;;  %v1735_v63 = vpop.f32.mrb[53].mxu1  ;;  %v4474_v8 = vld [vmem:[#allocation8 + $0x84] ss:$8 sps:$4 sm:$0xff]  }
 0x3be   : > { %v1736_v0 = vadd.f32 %v1735_v63, %v4396_v52  ;;  %v1737_v1 = vpop.f32.mrb[54].mxu1  ;;  %2088 = vmatprep.mubr.bf16.mxu0 %v1803_v61  ;;  %v4471_v61 = vld [vmem:[#allocation8 + $0x70] ss:$8 sps:$4 sm:$0xff]   ;;  %v4480_v63 = vld [vmem:[#allocation8 + $0x94] ss:$8 sps:$4 sm:$0xff]  }
 0x3bf   : > { %v1738_v2 = vadd.f32 %v1737_v1, %v4393_v51  ;;  %v1739_v4 = vpop.f32.mrb[55].mxu1  ;;  %2089 = vmatmul.mubr.bf16.gmra.mrb[48].mxu0 %v1802_v60  ;;  %v1782_v9 = vmax.f32 %v1734_v62, 0.0  ;;  %v4468_v60 = vld [vmem:[#allocation8 + $0x74] ss:$8 sps:$4 sm:$0xff]   ;;  %v4477_v62 = vld [vmem:[#allocation8 + $0x80] ss:$8 sps:$4 sm:$0xff]  }
 0x3c0   : > { %v1740_v7 = vadd.f32 %v1739_v4, %v4396_v52  ;;  %v1783_v11 = vmax.f32 %v1736_v0, 0.0  ;;  %v4483_v0 = vld [vmem:[#allocation8 + $0x90] ss:$8 sps:$4 sm:$0xff]   ;;  %v4486_v1 = vld [vmem:[#allocation8 + $0xa4] ss:$8 sps:$4 sm:$0xff]  }
 0x3c1   : > { %v1784_v10 = vmax.f32 %v1738_v2, 0.0  ;;  %v4489_v2 = vld [vmem:[#allocation8 + $0xa0] ss:$8 sps:$4 sm:$0xff]   ;;  %v4492_v4 = vld [vmem:[#allocation8 + $0xb4] ss:$8 sps:$4 sm:$0xff]  }
 0x3c2   : > { %v1785_v12 = vmax.f32 %v1740_v7, 0.0  ;;  %v4495_v7 = vld [vmem:[#allocation8 + $0xb0] ss:$8 sps:$4 sm:$0xff]  }
 0x3c3   : > { %v1804_v13 = vpack.c.bf16 %v1784_v10, %v1782_v9  ;;  %v4498_v9 = vld [vmem:[#allocation8 + $0xc4] ss:$8 sps:$4 sm:$0xff]   ;;  %v4501_v10 = vld [vmem:[#allocation8 + $0xc0] ss:$8 sps:$4 sm:$0xff]  }
 0x3c4   : > { %v1805_v14 = vpack.c.bf16 %v1785_v12, %v1783_v11  ;;  %v1743_v15 = vpop.f32.mrb[56].mxu1  ;;  %v4504_v11 = vld [vmem:[#allocation8 + $0xd4] ss:$8 sps:$4 sm:$0xff]   ;;  %v4507_v12 = vld [vmem:[#allocation8 + $0xd0] ss:$8 sps:$4 sm:$0xff]  }
 0x3c5   : > { %v1744_v16 = vadd.f32 %v1743_v15, %v4393_v51  ;;  %v1745_v17 = vpop.f32.mrb[57].mxu1 }
 0x3c6   : > { %v1746_v18 = vadd.f32 %v1745_v17, %v4396_v52  ;;  %v1747_v19 = vpop.f32.mrb[58].mxu1  ;;  %2098 = vmatprep.mubr.bf16.mxu0 %v1805_v14 }
 0x3c7   : > { %v1748_v20 = vadd.f32 %v1747_v19, %v4393_v51  ;;  %v1749_v21 = vpop.f32.mrb[59].mxu1  ;;  %2099 = vmatmul.mubr.bf16.gmra.mrb[52].mxu0 %v1804_v13  ;;  %v1786_v22 = vmax.f32 %v1744_v16, 0.0  ;;  %v3155_v13 = vld [vmem:[%s4751_s4 + $0x4] sm:$0x3] }
 0x3c8   : > { %v1750_v26 = vadd.f32 %v1749_v21, %v4396_v52  ;;  %v1787_v27 = vmax.f32 %v1746_v18, 0.0  ;;  %v4515_v14 = vrot.slane %v3155_v13, %v4303_v3  ;;  %v4518_v15 = vrot.slane %v3155_v13, %v4308_v5 }
 0x3c9   : > { %v1788_v23 = vmax.f32 %v1748_v20, 0.0 }
 0x3ca   : > { %v1789_v24 = vmax.f32 %v1750_v26, 0.0 }
 0x3cb   : > { %v1806_v25 = vpack.c.bf16 %v1788_v23, %v1786_v22 }
 0x3cc   : > { %v1807_v28 = vpack.c.bf16 %v1789_v24, %v1787_v27  ;;  %v1753_v29 = vpop.f32.mrb[60].mxu1 }
 0x3cd   : > { %v1754_v30 = vadd.f32 %v1753_v29, %v4393_v51  ;;  %v1755_v31 = vpop.f32.mrb[61].mxu1 }
 0x3ce   : > { %v1756_v32 = vadd.f32 %v1755_v31, %v4396_v52  ;;  %v1757_v33 = vpop.f32.mrb[62].mxu1  ;;  %2108 = vmatprep.mubr.bf16.mxu0 %v1807_v28 }
 0x3cf   : > { %v1758_v34 = vadd.f32 %v1757_v33, %v4393_v51  ;;  %v1759_v35 = vpop.f32.mrb[63].mxu1  ;;  %2109 = vmatmul.mubr.bf16.gmra.mrb[56].mxu0 %v1806_v25  ;;  %v1790_v37 = vmax.f32 %v1754_v30, 0.0  ;;  %v4430_v51 = vld [vmem:[#allocation8] ss:$8 sps:$4 sm:$0xff]  }
 0x3d0   : > { %v1760_v36 = vadd.f32 %v1759_v35, %v4396_v52  ;;  %v1791_v39 = vmax.f32 %v1756_v32, 0.0  ;;  %v4432_v52 = vld [vmem:[#allocation8 + $0x14] ss:$8 sps:$4 sm:$0xff]   ;;  %2749 = vmatpush1.bf16.msra.mxu0 %v4430_v51 }
 0x3d1   : > { %v1792_v38 = vmax.f32 %v1758_v34, 0.0  ;;  %2750 = vmatprep.subr.bf16.mxu0 %v4432_v52 }
 0x3d2   : > { %v1793_v40 = vmax.f32 %v1760_v36, 0.0 }
 0x3d3   : > { %v1808_v41 = vpack.c.bf16 %v1792_v38, %v1790_v37 }
 0x3d4   : > { %v1809_v42 = vpack.c.bf16 %v1793_v40, %v1791_v39  ;;  %2751 = vmatpush1.bf16.msra.mxu0 %v4435_v48 }
 0x3d5   : > { %2752 = vmatprep.subr.bf16.mxu0 %v4438_v49 }
 0x3d6   : > { %2118 = vmatprep.mubr.bf16.mxu0 %v1809_v42 }
 0x3d7   : > { %2119 = vmatmul.mubr.bf16.gmra.mrb[60].mxu0 %v1808_v41 }
 0x3d8   : > { %2753 = vmatpush1.bf16.msra.mxu0 %v4441_v50 }
 0x3d9   : > { %2754 = vmatprep.subr.bf16.mxu0 %v4444_v53 }
 0x3dc   : > { %2755 = vmatpush1.bf16.msra.mxu0 %v4447_v54 }
 0x3dd   : > { %2756 = vmatprep.subr.bf16.mxu0 %v4450_v55 }
 0x3e0   : > { %2757 = vmatpush1.bf16.msra.mxu0 %v4453_v56 }
 0x3e1   : > { %2758 = vmatprep.subr.bf16.mxu0 %v4456_v57 }
 0x3e4   : > { %2759 = vmatpush1.bf16.msra.mxu0 %v4459_v58 }
 0x3e5   : > { %2760 = vmatprep.subr.bf16.mxu0 %v4462_v6 }
 0x3e8   : > { %2761 = vmatpush1.bf16.msra.mxu0 %v4465_v59 }
 0x3e9   : > { %2762 = vmatprep.subr.bf16.mxu0 %v4468_v60 }
 0x3ec   : > { %2763 = vmatpush1.bf16.msra.mxu0 %v4471_v61 }
 0x3ed   : > { %2764 = vmatprep.subr.bf16.mxu0 %v4474_v8 }
 0x3f0   : > { %2765 = vmatpush1.bf16.msra.mxu0 %v4477_v62 }
 0x3f1   : > { %2766 = vmatprep.subr.bf16.mxu0 %v4480_v63 }
 0x3f4   : > { %2767 = vmatpush1.bf16.msra.mxu0 %v4483_v0 }
 0x3f5   : > { %2768 = vmatprep.subr.bf16.mxu0 %v4486_v1 }
 0x3f8   : > { %2769 = vmatpush1.bf16.msra.mxu0 %v4489_v2 }
 0x3f9   : > { %2770 = vmatprep.subr.bf16.mxu0 %v4492_v4 }
 0x3fc   : > { %2771 = vmatpush1.bf16.msra.mxu0 %v4495_v7 }
 0x3fd   : > { %2772 = vmatprep.subr.bf16.mxu0 %v4498_v9 }
 0x400   : > { %2773 = vmatpush1.bf16.msra.mxu0 %v4501_v10 }
 0x401   : > { %2774 = vmatprep.subr.bf16.mxu0 %v4504_v11 }
 0x404   : > { %2775 = vmatpush1.bf16.msra.mxu0 %v4507_v12 }
 0x472   : > { %v2050_v16 = vpop.f32.mrb[32].mxu0 }
 0x473   : > { %v2051_v17 = vadd.f32 %v2050_v16, %v4515_v14  ;;  %v2052_v18 = vpop.f32.mrb[33].mxu0 }
 0x474   : > { %v2053_v19 = vadd.f32 %v2052_v18, %v4518_v15  ;;  %v2054_v20 = vpop.f32.mrb[34].mxu0 }
 0x475   : > { %v2055_v21 = vadd.f32 %v2054_v20, %v4515_v14  ;;  %v2056_v26 = vpop.f32.mrb[35].mxu0  ;;  %v2129_v23 = vmax.f32 %v2051_v17, 0.0 }
 0x476   : > { %v2057_v22 = vadd.f32 %v2056_v26, %v4518_v15  ;;  %v2130_v24 = vmax.f32 %v2053_v19, 0.0 }
 0x477   : > { %v2131_v27 = vmax.f32 %v2055_v21, 0.0 }
 0x478   : > { %v2132_v25 = vmax.f32 %v2057_v22, 0.0 }
 0x479   : > { %v2161_v28 = vpack.c.bf16 %v2131_v27, %v2129_v23 }
 0x47a   : > { %v2162_v29 = vpack.c.bf16 %v2132_v25, %v2130_v24  ;;  %v2060_v30 = vpop.f32.mrb[36].mxu0 }
 0x47b   : > { %v2061_v31 = vadd.f32 %v2060_v30, %v4515_v14  ;;  %v2062_v32 = vpop.f32.mrb[37].mxu0 }
 0x47c   : > { %v2063_v33 = vadd.f32 %v2062_v32, %v4518_v15  ;;  %v2064_v34 = vpop.f32.mrb[38].mxu0  ;;  %2415 = vmatprep.mubr.bf16.mxu1 %v2162_v29 }
 0x47d   : > { %v2065_v35 = vadd.f32 %v2064_v34, %v4515_v14  ;;  %v2066_v36 = vpop.f32.mrb[39].mxu0  ;;  %2416 = vmatmul.mubr.bf16.vlgmr.msra.gmra.mrb[64].mxu1 %v2161_v28  ;;  %v2133_v38 = vmax.f32 %v2061_v31, 0.0 }
 0x47e   : > { %v2067_v37 = vadd.f32 %v2066_v36, %v4518_v15  ;;  %3279 = vmatpush1.bf16.msra.mxu1 %v4430_v51  ;;  %v2134_v40 = vmax.f32 %v2063_v33, 0.0 }
 0x47f   : > { %v2135_v39 = vmax.f32 %v2065_v35, 0.0  ;;  %3264 = vmatprep.subr.bf16.mxu1 %v4432_v52 }
 0x480   : > { %v2136_v41 = vmax.f32 %v2067_v37, 0.0 }
 0x481   : > { %v2163_v42 = vpack.c.bf16 %v2135_v39, %v2133_v38 }
 0x482   : > { %v2164_v43 = vpack.c.bf16 %v2136_v41, %v2134_v40  ;;  %v2070_v44 = vpop.f32.mrb[40].mxu0  ;;  %3280 = vmatpush1.bf16.msra.mxu1 %v4435_v48 }
 0x483   : > { %v2071_v45 = vadd.f32 %v2070_v44, %v4515_v14  ;;  %v2072_v46 = vpop.f32.mrb[41].mxu0  ;;  %3265 = vmatprep.subr.bf16.mxu1 %v4438_v49 }
 0x484   : > { %v2073_v47 = vadd.f32 %v2072_v46, %v4518_v15  ;;  %v2074_v13 = vpop.f32.mrb[42].mxu0  ;;  %2425 = vmatprep.mubr.bf16.mxu1 %v2164_v43 }
 0x485   : > { %v2075_v51 = vadd.f32 %v2074_v13, %v4515_v14  ;;  %v2076_v16 = vpop.f32.mrb[43].mxu0  ;;  %2426 = vmatmul.mubr.bf16.gmra.mrb[68].mxu1 %v2163_v42  ;;  %v2137_v17 = vmax.f32 %v2071_v45, 0.0 }
 0x486   : > { %v2077_v52 = vadd.f32 %v2076_v16, %v4518_v15  ;;  %3281 = vmatpush1.bf16.msra.mxu1 %v4441_v50  ;;  %v2138_v48 = vmax.f32 %v2073_v47, 0.0 }
 0x487   : > { %v2139_v18 = vmax.f32 %v2075_v51, 0.0  ;;  %3266 = vmatprep.subr.bf16.mxu1 %v4444_v53 }
 0x488   : > { %v2140_v19 = vmax.f32 %v2077_v52, 0.0 }
 0x489   : > { %v2165_v20 = vpack.c.bf16 %v2139_v18, %v2137_v17 }
 0x48a   : > { %v2166_v49 = vpack.c.bf16 %v2140_v19, %v2138_v48  ;;  %v2080_v21 = vpop.f32.mrb[44].mxu0  ;;  %3282 = vmatpush1.bf16.msra.mxu1 %v4447_v54 }
 0x48b   : > { %v2081_v26 = vadd.f32 %v2080_v21, %v4515_v14  ;;  %v2082_v22 = vpop.f32.mrb[45].mxu0  ;;  %3267 = vmatprep.subr.bf16.mxu1 %v4450_v55 }
 0x48c   : > { %v2083_v23 = vadd.f32 %v2082_v22, %v4518_v15  ;;  %v2084_v27 = vpop.f32.mrb[46].mxu0  ;;  %2435 = vmatprep.mubr.bf16.mxu1 %v2166_v49 }
 0x48d   : > { %v2085_v50 = vadd.f32 %v2084_v27, %v4515_v14  ;;  %v2086_v24 = vpop.f32.mrb[47].mxu0  ;;  %2436 = vmatmul.mubr.bf16.gmra.mrb[72].mxu1 %v2165_v20  ;;  %v2141_v25 = vmax.f32 %v2081_v26, 0.0 }
 0x48e   : > { %v2087_v53 = vadd.f32 %v2086_v24, %v4518_v15  ;;  %3283 = vmatpush1.bf16.msra.mxu1 %v4453_v56  ;;  %v2142_v54 = vmax.f32 %v2083_v23, 0.0 }
 0x48f   : > { %v2143_v28 = vmax.f32 %v2085_v50, 0.0  ;;  %3268 = vmatprep.subr.bf16.mxu1 %v4456_v57 }
 0x490   : > { %v2144_v29 = vmax.f32 %v2087_v53, 0.0 }
 0x491   : > { %v2167_v30 = vpack.c.bf16 %v2143_v28, %v2141_v25 }
 0x492   : > { %v2168_v55 = vpack.c.bf16 %v2144_v29, %v2142_v54  ;;  %v2090_v31 = vpop.f32.mrb[48].mxu0  ;;  %3284 = vmatpush1.bf16.msra.mxu1 %v4459_v58 }
 0x493   : > { %v2091_v32 = vadd.f32 %v2090_v31, %v4515_v14  ;;  %v2092_v33 = vpop.f32.mrb[49].mxu0  ;;  %3269 = vmatprep.subr.bf16.mxu1 %v4462_v6 }
 0x494   : > { %v2093_v34 = vadd.f32 %v2092_v33, %v4518_v15  ;;  %v2094_v35 = vpop.f32.mrb[50].mxu0  ;;  %2445 = vmatprep.mubr.bf16.mxu1 %v2168_v55  ;;  %v3774_v55 = vld [vmem:[#allocation8 + $0xe4] ss:$8 sps:$4 sm:$0xff]  }
 0x495   : > { %v2095_v56 = vadd.f32 %v2094_v35, %v4515_v14  ;;  %v2096_v36 = vpop.f32.mrb[51].mxu0  ;;  %2446 = vmatmul.mubr.bf16.gmra.mrb[76].mxu1 %v2167_v30  ;;  %v2145_v37 = vmax.f32 %v2091_v32, 0.0  ;;  %2776 = vmatprep.subr.bf16.mxu0 %v3774_v55 }
 0x496   : > { %v2097_v57 = vadd.f32 %v2096_v36, %v4518_v15  ;;  %3285 = vmatpush1.bf16.msra.mxu1 %v4465_v59  ;;  %v2146_v58 = vmax.f32 %v2093_v34, 0.0 }
 0x497   : > { %v2147_v38 = vmax.f32 %v2095_v56, 0.0  ;;  %3270 = vmatprep.subr.bf16.mxu1 %v4468_v60 }
 0x498   : > { %v2148_v39 = vmax.f32 %v2097_v57, 0.0 }
 0x499   : > { %v2169_v40 = vpack.c.bf16 %v2147_v38, %v2145_v37 }
 0x49a   : > { %v2170_v6 = vpack.c.bf16 %v2148_v39, %v2146_v58  ;;  %v2100_v41 = vpop.f32.mrb[52].mxu0  ;;  %3286 = vmatpush1.bf16.msra.mxu1 %v4471_v61 }
 0x49b   : > { %v2101_v42 = vadd.f32 %v2100_v41, %v4515_v14  ;;  %v2102_v43 = vpop.f32.mrb[53].mxu0  ;;  %3271 = vmatprep.subr.bf16.mxu1 %v4474_v8 }
 0x49c   : > { %v2103_v44 = vadd.f32 %v2102_v43, %v4518_v15  ;;  %v2104_v45 = vpop.f32.mrb[54].mxu0  ;;  %2455 = vmatprep.mubr.bf16.mxu1 %v2170_v6 }
 0x49d   : > { %v2105_v59 = vadd.f32 %v2104_v45, %v4515_v14  ;;  %v2106_v46 = vpop.f32.mrb[55].mxu0  ;;  %2456 = vmatmul.mubr.bf16.gmra.mrb[80].mxu1 %v2169_v40  ;;  %v2149_v47 = vmax.f32 %v2101_v42, 0.0 }
 0x49e   : > { %v2107_v60 = vadd.f32 %v2106_v46, %v4518_v15  ;;  %3287 = vmatpush1.bf16.msra.mxu1 %v4477_v62  ;;  %v2150_v61 = vmax.f32 %v2103_v44, 0.0 }
 0x49f   : > { %v2151_v13 = vmax.f32 %v2105_v59, 0.0  ;;  %3272 = vmatprep.subr.bf16.mxu1 %v4480_v63 }
 0x4a0   : > { %v2152_v51 = vmax.f32 %v2107_v60, 0.0 }
 0x4a1   : > { %v2171_v16 = vpack.c.bf16 %v2151_v13, %v2149_v47 }
 0x4a2   : > { %v2172_v8 = vpack.c.bf16 %v2152_v51, %v2150_v61  ;;  %v2110_v52 = vpop.f32.mrb[56].mxu0  ;;  %3288 = vmatpush1.bf16.msra.mxu1 %v4483_v0 }
 0x4a3   : > { %v2111_v17 = vadd.f32 %v2110_v52, %v4515_v14  ;;  %v2112_v18 = vpop.f32.mrb[57].mxu0  ;;  %3273 = vmatprep.subr.bf16.mxu1 %v4486_v1 }
 0x4a4   : > { %v2113_v48 = vadd.f32 %v2112_v18, %v4518_v15  ;;  %v2114_v19 = vpop.f32.mrb[58].mxu0  ;;  %2465 = vmatprep.mubr.bf16.mxu1 %v2172_v8 }
 0x4a5   : > { %v2115_v62 = vadd.f32 %v2114_v19, %v4515_v14  ;;  %v2116_v20 = vpop.f32.mrb[59].mxu0  ;;  %2466 = vmatmul.mubr.bf16.gmra.mrb[84].mxu1 %v2171_v16  ;;  %v2153_v49 = vmax.f32 %v2111_v17, 0.0 }
 0x4a6   : > { %v2117_v63 = vadd.f32 %v2116_v20, %v4518_v15  ;;  %3289 = vmatpush1.bf16.msra.mxu1 %v4489_v2  ;;  %v2154_v0 = vmax.f32 %v2113_v48, 0.0 }
 0x4a7   : > { %v2155_v21 = vmax.f32 %v2115_v62, 0.0  ;;  %3274 = vmatprep.subr.bf16.mxu1 %v4492_v4 }
 0x4a8   : > { %v2156_v26 = vmax.f32 %v2117_v63, 0.0 }
 0x4a9   : > { %v2173_v22 = vpack.c.bf16 %v2155_v21, %v2153_v49 }
 0x4aa   : > { %v2174_v1 = vpack.c.bf16 %v2156_v26, %v2154_v0  ;;  %v2120_v23 = vpop.f32.mrb[60].mxu0  ;;  %3290 = vmatpush1.bf16.msra.mxu1 %v4495_v7 }
 0x4ab   : > { %v2121_v27 = vadd.f32 %v2120_v23, %v4515_v14  ;;  %v2122_v50 = vpop.f32.mrb[61].mxu0  ;;  %3275 = vmatprep.subr.bf16.mxu1 %v4498_v9 }
 0x4ac   : > { %v2123_v24 = vadd.f32 %v2122_v50, %v4518_v15  ;;  %v2124_v53 = vpop.f32.mrb[62].mxu0  ;;  %2475 = vmatprep.mubr.bf16.mxu1 %v2174_v1 }
 0x4ad   : > { %v2125_v2 = vadd.f32 %v2124_v53, %v4515_v14  ;;  %v2126_v25 = vpop.f32.mrb[63].mxu0  ;;  %2476 = vmatmul.mubr.bf16.gmra.mrb[88].mxu1 %v2173_v22  ;;  %v2157_v28 = vmax.f32 %v2121_v27, 0.0  ;;  %v3772_v14 = vld [vmem:[#allocation8 + $0xe0] ss:$8 sps:$4 sm:$0xff]  }
 0x4ae   : > { %v2127_v4 = vadd.f32 %v2126_v25, %v4518_v15  ;;  %3291 = vmatpush1.bf16.msra.mxu1 %v4501_v10  ;;  %v2158_v7 = vmax.f32 %v2123_v24, 0.0  ;;  %2777 = vmatpush1.bf16.msra.mxu0 %v3772_v14  ;;  %v3777_v15 = vld [vmem:[#allocation8 + $0xf4] ss:$8 sps:$4 sm:$0xff]   ;;  %v3775_v10 = vld [vmem:[#allocation8 + $0xf0] ss:$8 sps:$4 sm:$0xff]  }
 0x4af   : > { %v2159_v54 = vmax.f32 %v2125_v2, 0.0  ;;  %3276 = vmatprep.subr.bf16.mxu1 %v4504_v11  ;;  %2778 = vmatprep.subr.bf16.mxu0 %v3777_v15  ;;  %v3188_v11 = vld [vmem:[%s4751_s4 + $0x6] sm:$0x3] }
 0x4b0   : > { %v2160_v29 = vmax.f32 %v2127_v4, 0.0  ;;  %v4586_v31 = vrot.slane %v3188_v11, %v4308_v5 }
 0x4b1   : > { %v2175_v30 = vpack.c.bf16 %v2159_v54, %v2157_v28 }
 0x4b2   : > { %v2176_v9 = vpack.c.bf16 %v2160_v29, %v2158_v7  ;;  %3292 = vmatpush1.bf16.msra.mxu1 %v4507_v12  ;;  %2779 = vmatpush1.bf16.msra.mxu0 %v3775_v10  ;;  %v4583_v12 = vrot.slane %v3188_v11, %v4303_v3 }
 0x4b3   : > { %3277 = vmatprep.subr.bf16.mxu1 %v3774_v55 }
 0x4b4   : > { %2485 = vmatprep.mubr.bf16.mxu1 %v2176_v9 }
 0x4b5   : > { %2486 = vmatmul.mubr.bf16.gmra.mrb[92].mxu1 %v2175_v30 }
 0x4b6   : > { %3293 = vmatpush1.bf16.msra.mxu1 %v3772_v14 }
 0x4b7   : > { %3278 = vmatprep.subr.bf16.mxu1 %v3777_v15 }
 0x4ba   : > { %3294 = vmatpush1.bf16.msra.mxu1 %v3775_v10 }
 0x550   : > { %v2417_v32 = vpop.f32.mrb[64].mxu1 }
 0x551   : > { %v2418_v33 = vadd.f32 %v2417_v32, %v4583_v12  ;;  %v2419_v34 = vpop.f32.mrb[65].mxu1 }
 0x552   : > { %v2420_v35 = vadd.f32 %v2419_v34, %v4586_v31  ;;  %v2421_v56 = vpop.f32.mrb[66].mxu1 }
 0x553   : > { %v2422_v36 = vadd.f32 %v2421_v56, %v4583_v12  ;;  %v2423_v57 = vpop.f32.mrb[67].mxu1  ;;  %v2496_v38 = vmax.f32 %v2418_v33, 0.0 }
 0x554   : > { %v2424_v37 = vadd.f32 %v2423_v57, %v4586_v31  ;;  %v2497_v39 = vmax.f32 %v2420_v35, 0.0 }
 0x555   : > { %v2498_v58 = vmax.f32 %v2422_v36, 0.0 }
 0x556   : > { %v2499_v40 = vmax.f32 %v2424_v37, 0.0 }
 0x557   : > { %v2528_v6 = vpack.c.bf16 %v2498_v58, %v2496_v38 }
 0x558   : > { %v2529_v41 = vpack.c.bf16 %v2499_v40, %v2497_v39  ;;  %v2427_v42 = vpop.f32.mrb[68].mxu1 }
 0x559   : > { %v2428_v43 = vadd.f32 %v2427_v42, %v4583_v12  ;;  %v2429_v44 = vpop.f32.mrb[69].mxu1 }
 0x55a   : > { %v2430_v45 = vadd.f32 %v2429_v44, %v4586_v31  ;;  %v2431_v59 = vpop.f32.mrb[70].mxu1  ;;  %2780 = vmatprep.mubr.bf16.mxu0 %v2529_v41 }
 0x55b   : > { %v2432_v46 = vadd.f32 %v2431_v59, %v4583_v12  ;;  %v2433_v60 = vpop.f32.mrb[71].mxu1  ;;  %2781 = vmatmul.mubr.bf16.vlgmr.msra.gmra.mrb[64].mxu0 %v2528_v6  ;;  %v2500_v13 = vmax.f32 %v2428_v43, 0.0 }
 0x55c   : > { %v2434_v47 = vadd.f32 %v2433_v60, %v4586_v31  ;;  %v2501_v51 = vmax.f32 %v2430_v45, 0.0 }
 0x55d   : > { %v2502_v61 = vmax.f32 %v2432_v46, 0.0 }
 0x55e   : > { %v2503_v16 = vmax.f32 %v2434_v47, 0.0 }
 0x55f   : > { %v2530_v8 = vpack.c.bf16 %v2502_v61, %v2500_v13 }
 0x560   : > { %v2531_v52 = vpack.c.bf16 %v2503_v16, %v2501_v51  ;;  %v2437_v17 = vpop.f32.mrb[72].mxu1 }
 0x561   : > { %v2438_v18 = vadd.f32 %v2437_v17, %v4583_v12  ;;  %v2439_v48 = vpop.f32.mrb[73].mxu1 }
 0x562   : > { %v2440_v19 = vadd.f32 %v2439_v48, %v4586_v31  ;;  %v2441_v62 = vpop.f32.mrb[74].mxu1  ;;  %2790 = vmatprep.mubr.bf16.mxu0 %v2531_v52 }
 0x563   : > { %v2442_v20 = vadd.f32 %v2441_v62, %v4583_v12  ;;  %v2443_v63 = vpop.f32.mrb[75].mxu1  ;;  %2791 = vmatmul.mubr.bf16.gmra.mrb[68].mxu0 %v2530_v8  ;;  %v2504_v21 = vmax.f32 %v2438_v18, 0.0 }
 0x564   : > { %v2444_v49 = vadd.f32 %v2443_v63, %v4586_v31  ;;  %v2505_v26 = vmax.f32 %v2440_v19, 0.0 }
 0x565   : > { %v2506_v0 = vmax.f32 %v2442_v20, 0.0 }
 0x566   : > { %v2507_v22 = vmax.f32 %v2444_v49, 0.0 }
 0x567   : > { %v2532_v1 = vpack.c.bf16 %v2506_v0, %v2504_v21 }
 0x568   : > { %v2533_v23 = vpack.c.bf16 %v2507_v22, %v2505_v26  ;;  %v2447_v27 = vpop.f32.mrb[76].mxu1 }
 0x569   : > { %v2448_v50 = vadd.f32 %v2447_v27, %v4583_v12  ;;  %v2449_v24 = vpop.f32.mrb[77].mxu1 }
 0x56a   : > { %v2450_v53 = vadd.f32 %v2449_v24, %v4586_v31  ;;  %v2451_v2 = vpop.f32.mrb[78].mxu1  ;;  %2800 = vmatprep.mubr.bf16.mxu0 %v2533_v23 }
 0x56b   : > { %v2452_v25 = vadd.f32 %v2451_v2, %v4583_v12  ;;  %v2453_v4 = vpop.f32.mrb[79].mxu1  ;;  %2801 = vmatmul.mubr.bf16.gmra.mrb[72].mxu0 %v2532_v1  ;;  %v2508_v54 = vmax.f32 %v2448_v50, 0.0 }
 0x56c   : > { %v2454_v28 = vadd.f32 %v2453_v4, %v4586_v31  ;;  %v2509_v29 = vmax.f32 %v2450_v53, 0.0 }
 0x56d   : > { %v2510_v7 = vmax.f32 %v2452_v25, 0.0 }
 0x56e   : > { %v2511_v30 = vmax.f32 %v2454_v28, 0.0 }
 0x56f   : > { %v2534_v9 = vpack.c.bf16 %v2510_v7, %v2508_v54 }
 0x570   : > { %v2535_v55 = vpack.c.bf16 %v2511_v30, %v2509_v29  ;;  %v2457_v14 = vpop.f32.mrb[80].mxu1  ;;  %v2576_v29 = vld [vmem:[%s4753_s6] sm:$0x3] }
 0x571   : > { %v2458_v15 = vadd.f32 %v2457_v14, %v4583_v12  ;;  %v2459_v10 = vpop.f32.mrb[81].mxu1  ;;  %v4625_v30 = vrot.slane %v2576_v29, %v4303_v3 }
 0x572   : > { %v2460_v11 = vadd.f32 %v2459_v10, %v4586_v31  ;;  %v2461_v32 = vpop.f32.mrb[82].mxu1  ;;  %2810 = vmatprep.mubr.bf16.mxu0 %v2535_v55 }
 0x573   : > { %v2462_v33 = vadd.f32 %v2461_v32, %v4583_v12  ;;  %v2463_v34 = vpop.f32.mrb[83].mxu1  ;;  %2811 = vmatmul.mubr.bf16.gmra.mrb[76].mxu0 %v2534_v9  ;;  %v2512_v56 = vmax.f32 %v2458_v15, 0.0 }
 0x574   : > { %v2464_v35 = vadd.f32 %v2463_v34, %v4586_v31  ;;  %v2513_v57 = vmax.f32 %v2460_v11, 0.0 }
 0x575   : > { %v2514_v36 = vmax.f32 %v2462_v33, 0.0 }
 0x576   : > { %v2515_v37 = vmax.f32 %v2464_v35, 0.0 }
 0x577   : > { %v2536_v38 = vpack.c.bf16 %v2514_v36, %v2512_v56 }
 0x578   : > { %v2537_v58 = vpack.c.bf16 %v2515_v37, %v2513_v57  ;;  %v2467_v39 = vpop.f32.mrb[84].mxu1 }
 0x579   : > { %v2468_v40 = vadd.f32 %v2467_v39, %v4583_v12  ;;  %v2469_v6 = vpop.f32.mrb[85].mxu1 }
 0x57a   : > { %v2470_v41 = vadd.f32 %v2469_v6, %v4586_v31  ;;  %v2471_v42 = vpop.f32.mrb[86].mxu1  ;;  %2820 = vmatprep.mubr.bf16.mxu1 %v2537_v58 }
 0x57b   : > { %v2472_v43 = vadd.f32 %v2471_v42, %v4583_v12  ;;  %v2473_v44 = vpop.f32.mrb[87].mxu1  ;;  %2821 = vmatmul.mubr.bf16.vlgmr.msra.gmra.mrb[96].mxu1 %v2536_v38  ;;  %v2516_v59 = vmax.f32 %v2468_v40, 0.0 }
 0x57c   : > { %v2474_v45 = vadd.f32 %v2473_v44, %v4586_v31  ;;  %v2517_v60 = vmax.f32 %v2470_v41, 0.0 }
 0x57d   : > { %v2518_v46 = vmax.f32 %v2472_v43, 0.0 }
 0x57e   : > { %v2519_v47 = vmax.f32 %v2474_v45, 0.0 }
 0x57f   : > { %v2538_v13 = vpack.c.bf16 %v2518_v46, %v2516_v59 }
 0x580   : > { %v2539_v61 = vpack.c.bf16 %v2519_v47, %v2517_v60  ;;  %v2477_v51 = vpop.f32.mrb[88].mxu1 }
 0x581   : > { %v2478_v16 = vadd.f32 %v2477_v51, %v4583_v12  ;;  %v2479_v8 = vpop.f32.mrb[89].mxu1 }
 0x582   : > { %v2480_v52 = vadd.f32 %v2479_v8, %v4586_v31  ;;  %v2481_v17 = vpop.f32.mrb[90].mxu1  ;;  %2830 = vmatprep.mubr.bf16.mxu1 %v2539_v61 }
 0x583   : > { %v2482_v18 = vadd.f32 %v2481_v17, %v4583_v12  ;;  %v2483_v48 = vpop.f32.mrb[91].mxu1  ;;  %2831 = vmatmul.mubr.bf16.gmra.mrb[100].mxu1 %v2538_v13  ;;  %v2520_v62 = vmax.f32 %v2478_v16, 0.0 }
 0x584   : > { %v2484_v19 = vadd.f32 %v2483_v48, %v4586_v31  ;;  %v2521_v63 = vmax.f32 %v2480_v52, 0.0 }
 0x585   : > { %v2522_v20 = vmax.f32 %v2482_v18, 0.0 }
 0x586   : > { %v2523_v49 = vmax.f32 %v2484_v19, 0.0 }
 0x587   : > { %v2540_v21 = vpack.c.bf16 %v2522_v20, %v2520_v62 }
 0x588   : > { %v2541_v0 = vpack.c.bf16 %v2523_v49, %v2521_v63  ;;  %v2487_v26 = vpop.f32.mrb[92].mxu1 }
 0x589   : > { %v2488_v22 = vadd.f32 %v2487_v26, %v4583_v12  ;;  %v2489_v1 = vpop.f32.mrb[93].mxu1 }
 0x58a   : > { %v2490_v23 = vadd.f32 %v2489_v1, %v4586_v31  ;;  %v2491_v27 = vpop.f32.mrb[94].mxu1  ;;  %2840 = vmatprep.mubr.bf16.mxu1 %v2541_v0 }
 0x58b   : > { %v2492_v50 = vadd.f32 %v2491_v27, %v4583_v12  ;;  %v2493_v24 = vpop.f32.mrb[95].mxu1  ;;  %2841 = vmatmul.mubr.bf16.gmra.mrb[104].mxu1 %v2540_v21  ;;  %v2524_v2 = vmax.f32 %v2488_v22, 0.0  ;;  %v4628_v12 = vrot.slane %v2576_v29, %v4308_v5 }
 0x58c   : > { %v2494_v53 = vadd.f32 %v2493_v24, %v4586_v31  ;;  %v2525_v4 = vmax.f32 %v2490_v23, 0.0 }
 0x58d   : > { %v2526_v25 = vmax.f32 %v2492_v50, 0.0 }
 0x58e   : > { %v2527_v28 = vmax.f32 %v2494_v53, 0.0 }
 0x58f   : > { %v2542_v54 = vpack.c.bf16 %v2526_v25, %v2524_v2 }
 0x590   : > { %v2543_v7 = vpack.c.bf16 %v2527_v28, %v2525_v4 }
 0x592   : > { %2850 = vmatprep.mubr.bf16.mxu1 %v2543_v7 }
 0x593   : > { %2851 = vmatmul.mubr.bf16.gmra.mrb[108].mxu1 %v2542_v54 }
 0x62e   : > { %v2782_v31 = vpop.f32.mrb[64].mxu0 }
 0x62f   : > { %v2783_v9 = vadd.f32 %v2782_v31, %v4625_v30  ;;  %v2784_v55 = vpop.f32.mrb[65].mxu0 }
 0x630   : > { %v2785_v14 = vadd.f32 %v2784_v55, %v4628_v12  ;;  %v2786_v15 = vpop.f32.mrb[66].mxu0 }
 0x631   : > { %2861 = vst [vmem:[%s4632_s20] sm:$0xff] %v2783_v9  ;;  %v2787_v3 = vadd.f32 %v2786_v15, %v4625_v30  ;;  %v2788_v5 = vpop.f32.mrb[67].mxu0 }
 0x632   : > { %2862 = vst [vmem:[%s4632_s20 + $0x8] sm:$0xff] %v2785_v14  ;;  %v2789_v10 = vadd.f32 %v2788_v5, %v4628_v12 }
 0x633   : > { %2863 = vst [vmem:[%s4632_s20 + $0x10] sm:$0xff] %v2787_v3 }
 0x634   : > { %2864 = vst [vmem:[%s4632_s20 + $0x18] sm:$0xff] %v2789_v10 }
 0x636   : > { %v2792_v11 = vpop.f32.mrb[68].mxu0 }
 0x637   : > { %v2793_v32 = vadd.f32 %v2792_v11, %v4625_v30  ;;  %v2794_v33 = vpop.f32.mrb[69].mxu0 }
 0x638   : > { %v2795_v34 = vadd.f32 %v2794_v33, %v4628_v12  ;;  %v2796_v35 = vpop.f32.mrb[70].mxu0 }
 0x639   : > { %2865 = vst [vmem:[%s4632_s20 + $0x20] sm:$0xff] %v2793_v32  ;;  %v2797_v56 = vadd.f32 %v2796_v35, %v4625_v30  ;;  %v2798_v36 = vpop.f32.mrb[71].mxu0 }
 0x63a   : > { %2866 = vst [vmem:[%s4632_s20 + $0x28] sm:$0xff] %v2795_v34  ;;  %v2799_v57 = vadd.f32 %v2798_v36, %v4628_v12 }
 0x63b   : > { %2867 = vst [vmem:[%s4632_s20 + $0x30] sm:$0xff] %v2797_v56 }
 0x63c   : > { %2868 = vst [vmem:[%s4632_s20 + $0x38] sm:$0xff] %v2799_v57 }
 0x63e   : > { %v2802_v37 = vpop.f32.mrb[72].mxu0 }
 0x63f   : > { %v2803_v38 = vadd.f32 %v2802_v37, %v4625_v30  ;;  %v2804_v58 = vpop.f32.mrb[73].mxu0 }
 0x640   : > { %v2805_v39 = vadd.f32 %v2804_v58, %v4628_v12  ;;  %v2806_v40 = vpop.f32.mrb[74].mxu0 }
 0x641   : > { %2869 = vst [vmem:[%s4632_s20 + $0x40] sm:$0xff] %v2803_v38  ;;  %v2807_v6 = vadd.f32 %v2806_v40, %v4625_v30  ;;  %v2808_v41 = vpop.f32.mrb[75].mxu0 }
 0x642   : > { %2870 = vst [vmem:[%s4632_s20 + $0x48] sm:$0xff] %v2805_v39  ;;  %v2809_v42 = vadd.f32 %v2808_v41, %v4628_v12 }
 0x643   : > { %2871 = vst [vmem:[%s4632_s20 + $0x50] sm:$0xff] %v2807_v6 }
 0x644   : > { %2872 = vst [vmem:[%s4632_s20 + $0x58] sm:$0xff] %v2809_v42 }
 0x646   : > { %v2812_v43 = vpop.f32.mrb[76].mxu0 }
 0x647   : > { %v2813_v44 = vadd.f32 %v2812_v43, %v4625_v30  ;;  %v2814_v45 = vpop.f32.mrb[77].mxu0 }
 0x648   : > { %v2815_v59 = vadd.f32 %v2814_v45, %v4628_v12  ;;  %v2816_v46 = vpop.f32.mrb[78].mxu0 }
 0x649   : > { %2873 = vst [vmem:[%s4632_s20 + $0x60] sm:$0xff] %v2813_v44  ;;  %v2817_v60 = vadd.f32 %v2816_v46, %v4625_v30  ;;  %v2818_v47 = vpop.f32.mrb[79].mxu0 }
 0x64a   : > { %2874 = vst [vmem:[%s4632_s20 + $0x68] sm:$0xff] %v2815_v59  ;;  %v2819_v13 = vadd.f32 %v2818_v47, %v4628_v12 }
 0x64b   : > { %2875 = vst [vmem:[%s4632_s20 + $0x70] sm:$0xff] %v2817_v60 }
 0x64c   : > { %2876 = vst [vmem:[%s4632_s20 + $0x78] sm:$0xff] %v2819_v13 }
 0x64e   : > { %v2822_v61 = vpop.f32.mrb[96].mxu1 }
 0x64f   : > { %v2823_v51 = vadd.f32 %v2822_v61, %v4625_v30  ;;  %v2824_v16 = vpop.f32.mrb[97].mxu1 }
 0x650   : > { %v2825_v8 = vadd.f32 %v2824_v16, %v4628_v12  ;;  %v2826_v52 = vpop.f32.mrb[98].mxu1 }
 0x651   : > { %2877 = vst [vmem:[%s4632_s20 + $0x80] sm:$0xff] %v2823_v51  ;;  %v2827_v17 = vadd.f32 %v2826_v52, %v4625_v30  ;;  %v2828_v18 = vpop.f32.mrb[99].mxu1 }
 0x652   : > { %2878 = vst [vmem:[%s4632_s20 + $0x88] sm:$0xff] %v2825_v8  ;;  %v2829_v48 = vadd.f32 %v2828_v18, %v4628_v12 }
 0x653   : > { %2879 = vst [vmem:[%s4632_s20 + $0x90] sm:$0xff] %v2827_v17 }
 0x654   : > { %2880 = vst [vmem:[%s4632_s20 + $0x98] sm:$0xff] %v2829_v48 }
 0x656   : > { %v2832_v19 = vpop.f32.mrb[100].mxu1 }
 0x657   : > { %v2833_v62 = vadd.f32 %v2832_v19, %v4625_v30  ;;  %v2834_v20 = vpop.f32.mrb[101].mxu1 }
 0x658   : > { %v2835_v63 = vadd.f32 %v2834_v20, %v4628_v12  ;;  %v2836_v49 = vpop.f32.mrb[102].mxu1 }
 0x659   : > { %2881 = vst [vmem:[%s4632_s20 + $0xa0] sm:$0xff] %v2833_v62  ;;  %v2837_v21 = vadd.f32 %v2836_v49, %v4625_v30  ;;  %v2838_v0 = vpop.f32.mrb[103].mxu1 }
 0x65a   : > { %2882 = vst [vmem:[%s4632_s20 + $0xa8] sm:$0xff] %v2835_v63  ;;  %v2839_v26 = vadd.f32 %v2838_v0, %v4628_v12 }
 0x65b   : > { %2883 = vst [vmem:[%s4632_s20 + $0xb0] sm:$0xff] %v2837_v21 }
 0x65c   : > { %2884 = vst [vmem:[%s4632_s20 + $0xb8] sm:$0xff] %v2839_v26 }
 0x65e   : > { %v2842_v22 = vpop.f32.mrb[104].mxu1 }
 0x65f   : > { %v2843_v1 = vadd.f32 %v2842_v22, %v4625_v30  ;;  %v2844_v23 = vpop.f32.mrb[105].mxu1 }
 0x660   : > { %v2845_v27 = vadd.f32 %v2844_v23, %v4628_v12  ;;  %v2846_v50 = vpop.f32.mrb[106].mxu1 }
 0x661   : > { %2885 = vst [vmem:[%s4632_s20 + $0xc0] sm:$0xff] %v2843_v1  ;;  %v2847_v24 = vadd.f32 %v2846_v50, %v4625_v30  ;;  %v2848_v53 = vpop.f32.mrb[107].mxu1 }
 0x662   : > { %2886 = vst [vmem:[%s4632_s20 + $0xc8] sm:$0xff] %v2845_v27  ;;  %v2849_v2 = vadd.f32 %v2848_v53, %v4628_v12 }
 0x663   : > { %2887 = vst [vmem:[%s4632_s20 + $0xd0] sm:$0xff] %v2847_v24 }
 0x664   : > { %2888 = vst [vmem:[%s4632_s20 + $0xd8] sm:$0xff] %v2849_v2 }
 0x666   : > { %v2852_v25 = vpop.f32.mrb[108].mxu1 }
 0x667   : > { %v2853_v4 = vadd.f32 %v2852_v25, %v4625_v30  ;;  %v2854_v28 = vpop.f32.mrb[109].mxu1 }
 0x668   : > { %v2855_v54 = vadd.f32 %v2854_v28, %v4628_v12  ;;  %v2856_v7 = vpop.f32.mrb[110].mxu1 }
 0x669   : > { %2889 = vst [vmem:[%s4632_s20 + $0xe0] sm:$0xff] %v2853_v4  ;;  %v2857_v29 = vadd.f32 %v2856_v7, %v4625_v30  ;;  %v2858_v31 = vpop.f32.mrb[111].mxu1 }
 0x66a   : > { %2890 = vst [vmem:[%s4632_s20 + $0xe8] sm:$0xff] %v2855_v54  ;;  %v2859_v9 = vadd.f32 %v2858_v31, %v4628_v12 }
 0x66b   : > { %2891 = vst [vmem:[%s4632_s20 + $0xf0] sm:$0xff] %v2857_v29 }
 0x66c   : > { %2892 = vst [vmem:[%s4632_s20 + $0xf8] sm:$0xff] %v2859_v9 }
 0x66d   : > { %3905 = shalt.err (!%p3902_p4)
}
 0x66e   : > { %s3906_s8 = scalar_lea.hbm %s4697_s11, 4096  ;;  %s3910_s13 = scalar_lea.hbm %s4754_s7, 8192 }
 0x66f   : > { %p3907_p9 = scmp.ne.s32.totalorder %s4697_s11, %s3906_s8  ;;  %p3911_p8 = scmp.lt.u32.totalorder %s4697_s11, %s4754_s7 }
 0x670   : > { %p3912_p13 = scmp.lt.u32.totalorder %s3910_s13, %s3906_s8  ;;  %p3914_p10 = scmp.lt.u32.totalorder %s3906_s8, %s4697_s11 }
 0x671   : > { %p3908_p0 = pnand %p3907_p9, %p4173_p5 }
 0x672   : > { %p3913_p6 = por %p3912_p13, %p3911_p8 }
 0x673   : > { %p3909_p11 = pneg %p3908_p0 }
 0x674   : > { %p3915_p3 = por %p3914_p10, %p3913_p6 }
 0x676   : > { %p3916_p7 = pnand %p3915_p3, %p3909_p11 }
 0x678   : > { %3919 = shalt.err (!%p3916_p7)
}
 0x679   : > { %s3977_s23 = smov 256   ;;  %s3978_s10 = smov 16  }
 0x67a   : > { %3373 = dma.vmem_to_hbm [thread:$0]  (%p4173_p5), %s4699_s9, 4096, %s4697_s11, %s2894_s28, %s3977_s23, %s3977_s23, %s3978_s10  }
 0x67b PF: > { %s4774_s14 = sld [smem:[#allocation15_spill]]  ;;  %s2923_s15 = sand.u32 1, %s3954_s24  }
 0x67c   : > { %p4776_p1 = scmp.ge.s32.totalorder %s3966_s27, 2  ;;  %s2924_s29 = scalar_lea.sflag [#allocation4], %s2923_s15 }
 0x681   : > { %p4775_p12 = scmp.ne.s32.totalorder %s4774_s14, 0 }
 0x683   : > { %p3390_p2 = pnand %p4776_p1, %p4775_p12 }
 0x685   : > { %3949 = dma.done.wait (!%p3390_p2), %s2924_s29, 4096  }
 0x686   : > { %3951 = vsyncadd (!%p3390_p2), %s2924_s29, 4294963200  ;;  %p22_p4 = scmp.ge.s32.totalorder %s4159_s22, 4   ;;  %s4777_s24 = smov %s3958_s25 }
 0x687   : > { %s4778_s25 = smov %s3962_s26  ;;  %s4779_s26 = smov %s4169_s18 }
 0x688   : > { %s4780_s27 = smov %s4159_s22  ;;  %24 = sbr.rel (!%p22_p4) target bundleno = 7 (0x7), region = 111 }
 0x68f   :  { %2929 = vsyncpa [#allocation3], 1 }
 0x690   :  { %2931 = vsyncpa [#allocation3 + $0x1], 1 }
 0x691   :  { %2932 = vsyncpa [#allocation6], 1 }
 0x692   :  { %2933 = vsyncpa [#allocation9], 1 }
 0x693   :  { %2934 = vsyncpa [#allocation4], 1 }
 0x694   :  { %2936 = vsyncpa [#allocation4 + $0x1], 1 }

</bundles_post_ra>
